<compile_context>
chip_gen: v6e
topology: v6e:2x2x1
jax: 0.10.0
libtpu: 0.0.40
codegen_flags: <defaults>
</compile_context>

<pallas_src>
import functools

import jax
import jax.numpy as jnp
from jax.experimental import pallas as pl
from jax.experimental.pallas import tpu as pltpu  # noqa: F401  (TPU backend)


def gru_forward_kernel(ids_ref, emb_ref, wih_ref, whh_ref, bih_ref, bhh_ref,
                       wout_ref, bout_ref, out_ref, *, T, B_pad, H_pad, out_size):
    """Single-invocation fused kernel.

    Refs (all whole-array VMEM blocks):
      ids_ref : (T*B_pad, 1) int32   time-major flattened token ids
      emb_ref : (V_pad, H_pad)       embedding table (zero padded)
      wih_ref : (H_pad, 3*H_pad)     W_ih^T, per-gate padded, gate order r,z,n
      whh_ref : (H_pad, 3*H_pad)     W_hh^T, per-gate padded
      bih_ref : (1, 3*H_pad)         b_ih (per-gate padded)
      bhh_ref : (1, 3*H_pad)         b_hh (per-gate padded)
      wout_ref: (H_pad, O_pad)       W_out^T (zero padded)
      bout_ref: (1, O_pad)           b_out  (zero padded)
      out_ref : (B_pad, O_pad)       log-probabilities (pad cols ~ -inf)
    """
    V_pad = emb_ref.shape[0]
    N = T * B_pad

    # Fused embedding lookup: one-hot(ids) @ table  (exact for f32 — adds 0s).
    ids = ids_ref[...]                                               # (N, 1)
    vocab_iota = jax.lax.broadcasted_iota(jnp.int32, (N, V_pad), 1)
    onehot = (vocab_iota == ids).astype(jnp.float32)                 # (N, V_pad)
    x = jnp.dot(onehot, emb_ref[...], preferred_element_type=jnp.float32)  # (N, H_pad)

    # Hoisted input-gate pre-activations for ALL timesteps (one big matmul,
    # off the serial critical path).
    gi = jnp.dot(x, wih_ref[...], preferred_element_type=jnp.float32) + bih_ref[...]

    whh = whh_ref[...]
    bhh = bhh_ref[...]

    h = jnp.zeros((B_pad, H_pad), jnp.float32)
    for t in range(T):  # static T -> fully unrolled; only gh matmul is serial
        gi_t = gi[t * B_pad:(t + 1) * B_pad, :]                      # (B_pad, 3H_pad)
        gh = jnp.dot(h, whh, preferred_element_type=jnp.float32) + bhh

        # Gate slices land on 128-lane boundaries (H_pad == 128k) -> free.
        i_r = gi_t[:, 0:H_pad]
        i_z = gi_t[:, H_pad:2 * H_pad]
        i_n = gi_t[:, 2 * H_pad:3 * H_pad]
        h_r = gh[:, 0:H_pad]
        h_z = gh[:, H_pad:2 * H_pad]
        h_n = gh[:, 2 * H_pad:3 * H_pad]

        r = jax.nn.sigmoid(i_r + h_r)
        z = jax.nn.sigmoid(i_z + h_z)
        n = jnp.tanh(i_n + r * h_n)          # b_hn stays inside r * (.)  (PyTorch)
        h = (1.0 - z) * n + z * h

    # Head: Linear on the final hidden state == out[:, -1, :] of the full Linear.
    logits = jnp.dot(h, wout_ref[...], preferred_element_type=jnp.float32) + bout_ref[...]
    lane = jax.lax.broadcasted_iota(jnp.int32, logits.shape, 1)
    logits = jnp.where(lane < out_size, logits, jnp.float32(-1e30))  # mask pad cols

    m = jnp.max(logits, axis=1, keepdims=True)
    shifted = logits - m
    lse = jnp.log(jnp.sum(jnp.exp(shifted), axis=1, keepdims=True))
    out_ref[...] = shifted - lse                                     # log_softmax


def _round_up(x, m):
    return (x + m - 1) // m * m


@jax.jit
def simple_rnn_forward(token_ids, params):
    """token_ids: int32 (B, T). Returns log-probs (B, O) float32."""
    emb = params["embedding"].astype(jnp.float32)    # (V, H)
    w_ih = params["w_ih"].astype(jnp.float32)        # (3H, H)  PyTorch layout, gates r,z,n
    w_hh = params["w_hh"].astype(jnp.float32)        # (3H, H)
    b_ih = params["b_ih"].astype(jnp.float32)        # (3H,)
    b_hh = params["b_hh"].astype(jnp.float32)        # (3H,)
    w_out = params["w_out"].astype(jnp.float32)      # (O, H)
    b_out = params["b_out"].astype(jnp.float32)      # (O,)

    B, T = token_ids.shape
    V, H = emb.shape
    O = w_out.shape[0]
    assert T >= 1, "empty sequence not supported"

    B_pad = _round_up(B, 8)       # sublane alignment
    H_pad = _round_up(H, 128)     # lane alignment -> gate slices on vreg bounds
    V_pad = _round_up(V, 128)
    O_pad = _round_up(O, 128)     # lane-dense output stores

    # Token ids: pad batch, go time-major and flatten so rows
    # [t*B_pad, (t+1)*B_pad) of the hoisted gi correspond to timestep t.
    ids_p = jnp.pad(token_ids.astype(jnp.int32), ((0, B_pad - B), (0, 0)))
    ids_col = jnp.transpose(ids_p).reshape(T * B_pad, 1)              # (N, 1)

    emb_p = jnp.zeros((V_pad, H_pad), jnp.float32).at[:V, :H].set(emb)

    def pack_gates(w):  # (3H, H) -> (H_pad, 3*H_pad), per-gate zero-padded, order r,z,n
        blocks = []
        for g in range(3):
            wg_t = jnp.transpose(w[g * H:(g + 1) * H, :])             # (H, H)
            blocks.append(jnp.zeros((H_pad, H_pad), jnp.float32).at[:H, :H].set(wg_t))
        return jnp.concatenate(blocks, axis=1)

    def pack_bias(b):   # (3H,) -> (1, 3*H_pad)
        blocks = [jnp.zeros((H_pad,), jnp.float32).at[:H].set(b[g * H:(g + 1) * H])
                  for g in range(3)]
        return jnp.concatenate(blocks).reshape(1, 3 * H_pad)

    wih_p = pack_gates(w_ih)
    whh_p = pack_gates(w_hh)
    bih_p = pack_bias(b_ih)
    bhh_p = pack_bias(b_hh)
    wout_p = jnp.zeros((H_pad, O_pad), jnp.float32).at[:H, :O].set(jnp.transpose(w_out))
    bout_p = jnp.zeros((1, O_pad), jnp.float32).at[0, :O].set(b_out)

    N = T * B_pad
    flops = (2 * N * V_pad * H_pad                     # one-hot embed matmul
             + 2 * N * H_pad * 3 * H_pad               # hoisted gi
             + T * 2 * B_pad * H_pad * 3 * H_pad       # recurrent gh
             + 2 * B_pad * H_pad * O_pad               # output head
             + 12 * T * B_pad * H_pad)                 # gate elementwise
    transcendentals = 3 * T * B_pad * H_pad + B_pad * O_pad
    bytes_accessed = 4 * (ids_col.size + emb_p.size + wih_p.size + whh_p.size
                          + bih_p.size + bhh_p.size + wout_p.size + bout_p.size
                          + B_pad * O_pad)

    kernel = functools.partial(gru_forward_kernel, T=T, B_pad=B_pad,
                               H_pad=H_pad, out_size=O)

    out_pad = pl.pallas_call(
        kernel,
        out_shape=jax.ShapeDtypeStruct((B_pad, O_pad), jnp.float32),
        cost_estimate=pl.CostEstimate(flops=flops,
                                      transcendentals=transcendentals,
                                      bytes_accessed=bytes_accessed),
    )(ids_col, emb_p, wih_p, whh_p, bih_p, bhh_p, wout_p, bout_p)

    return out_pad[:B, :O]


def simple_rnn_reference(token_ids, params):
    """Pure-JAX reference (PyTorch GRU semantics) for correctness checking."""
    emb, w_ih, w_hh = params["embedding"], params["w_ih"], params["w_hh"]
    b_ih, b_hh, w_out, b_out = params["b_ih"], params["b_hh"], params["w_out"], params["b_out"]
    B, T = token_ids.shape
    H = emb.shape[1]
    x = jnp.take(emb, token_ids, axis=0)                  # (B, T, H)

    def step(h, x_t):
        gi = x_t @ w_ih.T + b_ih
        gh = h @ w_hh.T + b_hh
        i_r, i_z, i_n = jnp.split(gi, 3, axis=1)
        h_r, h_z, h_n = jnp.split(gh, 3, axis=1)
        r = jax.nn.sigmoid(i_r + h_r)
        z = jax.nn.sigmoid(i_z + h_z)
        n = jnp.tanh(i_n + r * h_n)
        return (1.0 - z) * n + z * h, None

    h0 = jnp.zeros((B, H), jnp.float32)
    hT, _ = jax.lax.scan(step, h0, jnp.transpose(x, (1, 0, 2)))
    logits = hT @ w_out.T + b_out
    return jax.nn.log_softmax(logits, axis=1)


def init_params(key, vocab_size, hidden_size, out_size):
    ks = jax.random.split(key, 7)
    H = hidden_size
    bound = 1.0 / jnp.sqrt(H)
    return {
        "embedding": jax.random.normal(ks[0], (vocab_size, H), jnp.float32),
        "w_ih": jax.random.uniform(ks[1], (3 * H, H), jnp.float32, -bound, bound),
        "w_hh": jax.random.uniform(ks[2], (3 * H, H), jnp.float32, -bound, bound),
        "b_ih": jax.random.uniform(ks[3], (3 * H,), jnp.float32, -bound, bound),
        "b_hh": jax.random.uniform(ks[4], (3 * H,), jnp.float32, -bound, bound),
        "w_out": jax.random.uniform(ks[5], (out_size, H), jnp.float32, -bound, bound),
        "b_out": jax.random.uniform(ks[6], (out_size,), jnp.float32, -bound, bound),
    }


if __name__ == "__main__":
    VOCAB, HIDDEN, OUT = 16, 32, 4
    BATCH, SEQ = 2, 8

    key = jax.random.PRNGKey(0)
    pkey, ikey = jax.random.split(key)
    params = init_params(pkey, VOCAB, HIDDEN, OUT)
    token_ids = jax.random.randint(ikey, (BATCH, SEQ), 0, VOCAB, dtype=jnp.int32)

    log_probs = simple_rnn_forward(token_ids, params)
    jax.block_until_ready(log_probs)

    assert log_probs.shape == (BATCH, OUT)
    # log_softmax rows must exponentiate-sum to ~1 (pad columns masked in-kernel)
    assert jnp.allclose(jnp.sum(jnp.exp(log_probs), axis=1), 1.0, atol=1e-4)
    # match the pure-JAX reference (loose tol for MXU precision differences)
    ref = simple_rnn_reference(token_ids, params)
    assert jnp.allclose(log_probs, ref, atol=2e-2, rtol=2e-2), "kernel/ref mismatch"
    print("KERNEL_OK")
</pallas_src>

<mosaic_0001>
module attributes {stable_mosaic.version = 11 : i64} {
  func.func @gru_forward_kernel(%arg0: memref<64x1xi32, #tpu.memory_space<vmem>>, %arg1: memref<128x128xf32, #tpu.memory_space<vmem>>, %arg2: memref<128x384xf32, #tpu.memory_space<vmem>>, %arg3: memref<128x384xf32, #tpu.memory_space<vmem>>, %arg4: memref<1x384xf32, #tpu.memory_space<vmem>>, %arg5: memref<1x384xf32, #tpu.memory_space<vmem>>, %arg6: memref<128x128xf32, #tpu.memory_space<vmem>>, %arg7: memref<1x128xf32, #tpu.memory_space<vmem>>, %arg8: memref<8x128xf32, #tpu.memory_space<vmem>>) attributes {dimension_semantics = [], scalar_prefetch = 0 : i64, scratch_operands = 0 : i64, tpu.core_type = #tpu.core_type<tc>} {
    %c0 = arith.constant 0 : index
    %c0_0 = arith.constant 0 : index
    %0 = vector.load %arg0[%c0, %c0_0] : memref<64x1xi32, #tpu.memory_space<vmem>>, vector<64x1xi32>
    %1 = tpu.iota {dimensions = array<i32: 1>} : vector<64x128xi32>
    %2 = vector.broadcast %0 : vector<64x1xi32> to vector<64x128xi32>
    %3 = arith.cmpi eq, %1, %2 : vector<64x128xi32>
    %4 = arith.extui %3 : vector<64x128xi1> to vector<64x128xi32>
    %5 = arith.sitofp %4 : vector<64x128xi32> to vector<64x128xf32>
    %c0_1 = arith.constant 0 : index
    %c0_2 = arith.constant 0 : index
    %6 = vector.load %arg1[%c0_1, %c0_2] : memref<128x128xf32, #tpu.memory_space<vmem>>, vector<128x128xf32>
    %cst = arith.constant dense<0.000000e+00> : vector<64x128xf32>
    %7 = tpu.matmul %5, %6, %cst {dimension_numbers = #tpu.dot_dimension_numbers<[1], [0], [0], [1], [0, 0, 1, 1], [], []>} : vector<64x128xf32>, vector<128x128xf32>, vector<64x128xf32> -> vector<64x128xf32>
    %c0_3 = arith.constant 0 : index
    %c0_4 = arith.constant 0 : index
    %8 = vector.load %arg2[%c0_3, %c0_4] : memref<128x384xf32, #tpu.memory_space<vmem>>, vector<128x384xf32>
    %cst_5 = arith.constant dense<0.000000e+00> : vector<64x384xf32>
    %9 = tpu.matmul %7, %8, %cst_5 {dimension_numbers = #tpu.dot_dimension_numbers<[1], [0], [0], [1], [0, 0, 1, 1], [], []>} : vector<64x128xf32>, vector<128x384xf32>, vector<64x384xf32> -> vector<64x384xf32>
    %c0_6 = arith.constant 0 : index
    %c0_7 = arith.constant 0 : index
    %10 = vector.load %arg4[%c0_6, %c0_7] : memref<1x384xf32, #tpu.memory_space<vmem>>, vector<1x384xf32>
    %11 = vector.broadcast %10 : vector<1x384xf32> to vector<64x384xf32>
    %12 = arith.addf %9, %11 : vector<64x384xf32>
    %c0_8 = arith.constant 0 : index
    %c0_9 = arith.constant 0 : index
    %13 = vector.load %arg3[%c0_8, %c0_9] : memref<128x384xf32, #tpu.memory_space<vmem>>, vector<128x384xf32>
    %c0_10 = arith.constant 0 : index
    %c0_11 = arith.constant 0 : index
    %14 = vector.load %arg5[%c0_10, %c0_11] : memref<1x384xf32, #tpu.memory_space<vmem>>, vector<1x384xf32>
    %cst_12 = arith.constant 0.000000e+00 : f32
    %15 = vector.broadcast %cst_12 : f32 to vector<8x128xf32>
    %16 = vector.extract_strided_slice %12 {offsets = [0, 0], sizes = [8, 384], strides = [1, 1]} : vector<64x384xf32> to vector<8x384xf32>
    %cst_13 = arith.constant dense<0.000000e+00> : vector<8x384xf32>
    %17 = tpu.matmul %15, %13, %cst_13 {dimension_numbers = #tpu.dot_dimension_numbers<[1], [0], [0], [1], [0, 0, 1, 1], [], []>} : vector<8x128xf32>, vector<128x384xf32>, vector<8x384xf32> -> vector<8x384xf32>
    %18 = vector.broadcast %14 : vector<1x384xf32> to vector<8x384xf32>
    %19 = arith.addf %17, %18 : vector<8x384xf32>
    %20 = vector.extract_strided_slice %16 {offsets = [0, 0], sizes = [8, 128], strides = [1, 1]} : vector<8x384xf32> to vector<8x128xf32>
    %21 = vector.extract_strided_slice %16 {offsets = [0, 128], sizes = [8, 128], strides = [1, 1]} : vector<8x384xf32> to vector<8x128xf32>
    %22 = vector.extract_strided_slice %16 {offsets = [0, 256], sizes = [8, 128], strides = [1, 1]} : vector<8x384xf32> to vector<8x128xf32>
    %23 = vector.extract_strided_slice %19 {offsets = [0, 0], sizes = [8, 128], strides = [1, 1]} : vector<8x384xf32> to vector<8x128xf32>
    %24 = vector.extract_strided_slice %19 {offsets = [0, 128], sizes = [8, 128], strides = [1, 1]} : vector<8x384xf32> to vector<8x128xf32>
    %25 = vector.extract_strided_slice %19 {offsets = [0, 256], sizes = [8, 128], strides = [1, 1]} : vector<8x384xf32> to vector<8x128xf32>
    %26 = arith.addf %20, %23 : vector<8x128xf32>
    %27 = arith.negf %26 : vector<8x128xf32>
    %28 = math.exp %27 : vector<8x128xf32>
    %cst_14 = arith.constant 1.000000e+00 : f32
    %29 = vector.broadcast %cst_14 : f32 to vector<8x128xf32>
    %30 = arith.addf %29, %28 : vector<8x128xf32>
    %31 = arith.divf %29, %30 : vector<8x128xf32>
    %32 = arith.addf %21, %24 : vector<8x128xf32>
    %33 = arith.negf %32 : vector<8x128xf32>
    %34 = math.exp %33 : vector<8x128xf32>
    %cst_15 = arith.constant 1.000000e+00 : f32
    %35 = vector.broadcast %cst_15 : f32 to vector<8x128xf32>
    %36 = arith.addf %35, %34 : vector<8x128xf32>
    %37 = arith.divf %35, %36 : vector<8x128xf32>
    %38 = arith.mulf %31, %25 : vector<8x128xf32>
    %39 = arith.addf %22, %38 : vector<8x128xf32>
    %40 = math.tanh %39 : vector<8x128xf32>
    %cst_16 = arith.constant 1.000000e+00 : f32
    %41 = vector.broadcast %cst_16 : f32 to vector<8x128xf32>
    %42 = arith.subf %41, %37 : vector<8x128xf32>
    %43 = arith.mulf %42, %40 : vector<8x128xf32>
    %44 = arith.mulf %37, %15 : vector<8x128xf32>
    %45 = arith.addf %43, %44 : vector<8x128xf32>
    %46 = vector.extract_strided_slice %12 {offsets = [8, 0], sizes = [8, 384], strides = [1, 1]} : vector<64x384xf32> to vector<8x384xf32>
    %cst_17 = arith.constant dense<0.000000e+00> : vector<8x384xf32>
    %47 = tpu.matmul %45, %13, %cst_17 {dimension_numbers = #tpu.dot_dimension_numbers<[1], [0], [0], [1], [0, 0, 1, 1], [], []>} : vector<8x128xf32>, vector<128x384xf32>, vector<8x384xf32> -> vector<8x384xf32>
    %48 = vector.broadcast %14 : vector<1x384xf32> to vector<8x384xf32>
    %49 = arith.addf %47, %48 : vector<8x384xf32>
    %50 = vector.extract_strided_slice %46 {offsets = [0, 0], sizes = [8, 128], strides = [1, 1]} : vector<8x384xf32> to vector<8x128xf32>
    %51 = vector.extract_strided_slice %46 {offsets = [0, 128], sizes = [8, 128], strides = [1, 1]} : vector<8x384xf32> to vector<8x128xf32>
    %52 = vector.extract_strided_slice %46 {offsets = [0, 256], sizes = [8, 128], strides = [1, 1]} : vector<8x384xf32> to vector<8x128xf32>
    %53 = vector.extract_strided_slice %49 {offsets = [0, 0], sizes = [8, 128], strides = [1, 1]} : vector<8x384xf32> to vector<8x128xf32>
    %54 = vector.extract_strided_slice %49 {offsets = [0, 128], sizes = [8, 128], strides = [1, 1]} : vector<8x384xf32> to vector<8x128xf32>
    %55 = vector.extract_strided_slice %49 {offsets = [0, 256], sizes = [8, 128], strides = [1, 1]} : vector<8x384xf32> to vector<8x128xf32>
    %56 = arith.addf %50, %53 : vector<8x128xf32>
    %57 = arith.negf %56 : vector<8x128xf32>
    %58 = math.exp %57 : vector<8x128xf32>
    %cst_18 = arith.constant 1.000000e+00 : f32
    %59 = vector.broadcast %cst_18 : f32 to vector<8x128xf32>
    %60 = arith.addf %59, %58 : vector<8x128xf32>
    %61 = arith.divf %59, %60 : vector<8x128xf32>
    %62 = arith.addf %51, %54 : vector<8x128xf32>
    %63 = arith.negf %62 : vector<8x128xf32>
    %64 = math.exp %63 : vector<8x128xf32>
    %cst_19 = arith.constant 1.000000e+00 : f32
    %65 = vector.broadcast %cst_19 : f32 to vector<8x128xf32>
    %66 = arith.addf %65, %64 : vector<8x128xf32>
    %67 = arith.divf %65, %66 : vector<8x128xf32>
    %68 = arith.mulf %61, %55 : vector<8x128xf32>
    %69 = arith.addf %52, %68 : vector<8x128xf32>
    %70 = math.tanh %69 : vector<8x128xf32>
    %cst_20 = arith.constant 1.000000e+00 : f32
    %71 = vector.broadcast %cst_20 : f32 to vector<8x128xf32>
    %72 = arith.subf %71, %67 : vector<8x128xf32>
    %73 = arith.mulf %72, %70 : vector<8x128xf32>
    %74 = arith.mulf %67, %45 : vector<8x128xf32>
    %75 = arith.addf %73, %74 : vector<8x128xf32>
    %76 = vector.extract_strided_slice %12 {offsets = [16, 0], sizes = [8, 384], strides = [1, 1]} : vector<64x384xf32> to vector<8x384xf32>
    %cst_21 = arith.constant dense<0.000000e+00> : vector<8x384xf32>
    %77 = tpu.matmul %75, %13, %cst_21 {dimension_numbers = #tpu.dot_dimension_numbers<[1], [0], [0], [1], [0, 0, 1, 1], [], []>} : vector<8x128xf32>, vector<128x384xf32>, vector<8x384xf32> -> vector<8x384xf32>
    %78 = vector.broadcast %14 : vector<1x384xf32> to vector<8x384xf32>
    %79 = arith.addf %77, %78 : vector<8x384xf32>
    %80 = vector.extract_strided_slice %76 {offsets = [0, 0], sizes = [8, 128], strides = [1, 1]} : vector<8x384xf32> to vector<8x128xf32>
    %81 = vector.extract_strided_slice %76 {offsets = [0, 128], sizes = [8, 128], strides = [1, 1]} : vector<8x384xf32> to vector<8x128xf32>
    %82 = vector.extract_strided_slice %76 {offsets = [0, 256], sizes = [8, 128], strides = [1, 1]} : vector<8x384xf32> to vector<8x128xf32>
    %83 = vector.extract_strided_slice %79 {offsets = [0, 0], sizes = [8, 128], strides = [1, 1]} : vector<8x384xf32> to vector<8x128xf32>
    %84 = vector.extract_strided_slice %79 {offsets = [0, 128], sizes = [8, 128], strides = [1, 1]} : vector<8x384xf32> to vector<8x128xf32>
    %85 = vector.extract_strided_slice %79 {offsets = [0, 256], sizes = [8, 128], strides = [1, 1]} : vector<8x384xf32> to vector<8x128xf32>
    %86 = arith.addf %80, %83 : vector<8x128xf32>
    %87 = arith.negf %86 : vector<8x128xf32>
    %88 = math.exp %87 : vector<8x128xf32>
    %cst_22 = arith.constant 1.000000e+00 : f32
    %89 = vector.broadcast %cst_22 : f32 to vector<8x128xf32>
    %90 = arith.addf %89, %88 : vector<8x128xf32>
    %91 = arith.divf %89, %90 : vector<8x128xf32>
    %92 = arith.addf %81, %84 : vector<8x128xf32>
    %93 = arith.negf %92 : vector<8x128xf32>
    %94 = math.exp %93 : vector<8x128xf32>
    %cst_23 = arith.constant 1.000000e+00 : f32
    %95 = vector.broadcast %cst_23 : f32 to vector<8x128xf32>
    %96 = arith.addf %95, %94 : vector<8x128xf32>
    %97 = arith.divf %95, %96 : vector<8x128xf32>
    %98 = arith.mulf %91, %85 : vector<8x128xf32>
    %99 = arith.addf %82, %98 : vector<8x128xf32>
    %100 = math.tanh %99 : vector<8x128xf32>
    %cst_24 = arith.constant 1.000000e+00 : f32
    %101 = vector.broadcast %cst_24 : f32 to vector<8x128xf32>
    %102 = arith.subf %101, %97 : vector<8x128xf32>
    %103 = arith.mulf %102, %100 : vector<8x128xf32>
    %104 = arith.mulf %97, %75 : vector<8x128xf32>
    %105 = arith.addf %103, %104 : vector<8x128xf32>
    %106 = vector.extract_strided_slice %12 {offsets = [24, 0], sizes = [8, 384], strides = [1, 1]} : vector<64x384xf32> to vector<8x384xf32>
    %cst_25 = arith.constant dense<0.000000e+00> : vector<8x384xf32>
    %107 = tpu.matmul %105, %13, %cst_25 {dimension_numbers = #tpu.dot_dimension_numbers<[1], [0], [0], [1], [0, 0, 1, 1], [], []>} : vector<8x128xf32>, vector<128x384xf32>, vector<8x384xf32> -> vector<8x384xf32>
    %108 = vector.broadcast %14 : vector<1x384xf32> to vector<8x384xf32>
    %109 = arith.addf %107, %108 : vector<8x384xf32>
    %110 = vector.extract_strided_slice %106 {offsets = [0, 0], sizes = [8, 128], strides = [1, 1]} : vector<8x384xf32> to vector<8x128xf32>
    %111 = vector.extract_strided_slice %106 {offsets = [0, 128], sizes = [8, 128], strides = [1, 1]} : vector<8x384xf32> to vector<8x128xf32>
    %112 = vector.extract_strided_slice %106 {offsets = [0, 256], sizes = [8, 128], strides = [1, 1]} : vector<8x384xf32> to vector<8x128xf32>
    %113 = vector.extract_strided_slice %109 {offsets = [0, 0], sizes = [8, 128], strides = [1, 1]} : vector<8x384xf32> to vector<8x128xf32>
    %114 = vector.extract_strided_slice %109 {offsets = [0, 128], sizes = [8, 128], strides = [1, 1]} : vector<8x384xf32> to vector<8x128xf32>
    %115 = vector.extract_strided_slice %109 {offsets = [0, 256], sizes = [8, 128], strides = [1, 1]} : vector<8x384xf32> to vector<8x128xf32>
    %116 = arith.addf %110, %113 : vector<8x128xf32>
    %117 = arith.negf %116 : vector<8x128xf32>
    %118 = math.exp %117 : vector<8x128xf32>
    %cst_26 = arith.constant 1.000000e+00 : f32
    %119 = vector.broadcast %cst_26 : f32 to vector<8x128xf32>
    %120 = arith.addf %119, %118 : vector<8x128xf32>
    %121 = arith.divf %119, %120 : vector<8x128xf32>
    %122 = arith.addf %111, %114 : vector<8x128xf32>
    %123 = arith.negf %122 : vector<8x128xf32>
    %124 = math.exp %123 : vector<8x128xf32>
    %cst_27 = arith.constant 1.000000e+00 : f32
    %125 = vector.broadcast %cst_27 : f32 to vector<8x128xf32>
    %126 = arith.addf %125, %124 : vector<8x128xf32>
    %127 = arith.divf %125, %126 : vector<8x128xf32>
    %128 = arith.mulf %121, %115 : vector<8x128xf32>
    %129 = arith.addf %112, %128 : vector<8x128xf32>
    %130 = math.tanh %129 : vector<8x128xf32>
    %cst_28 = arith.constant 1.000000e+00 : f32
    %131 = vector.broadcast %cst_28 : f32 to vector<8x128xf32>
    %132 = arith.subf %131, %127 : vector<8x128xf32>
    %133 = arith.mulf %132, %130 : vector<8x128xf32>
    %134 = arith.mulf %127, %105 : vector<8x128xf32>
    %135 = arith.addf %133, %134 : vector<8x128xf32>
    %136 = vector.extract_strided_slice %12 {offsets = [32, 0], sizes = [8, 384], strides = [1, 1]} : vector<64x384xf32> to vector<8x384xf32>
    %cst_29 = arith.constant dense<0.000000e+00> : vector<8x384xf32>
    %137 = tpu.matmul %135, %13, %cst_29 {dimension_numbers = #tpu.dot_dimension_numbers<[1], [0], [0], [1], [0, 0, 1, 1], [], []>} : vector<8x128xf32>, vector<128x384xf32>, vector<8x384xf32> -> vector<8x384xf32>
    %138 = vector.broadcast %14 : vector<1x384xf32> to vector<8x384xf32>
    %139 = arith.addf %137, %138 : vector<8x384xf32>
    %140 = vector.extract_strided_slice %136 {offsets = [0, 0], sizes = [8, 128], strides = [1, 1]} : vector<8x384xf32> to vector<8x128xf32>
    %141 = vector.extract_strided_slice %136 {offsets = [0, 128], sizes = [8, 128], strides = [1, 1]} : vector<8x384xf32> to vector<8x128xf32>
    %142 = vector.extract_strided_slice %136 {offsets = [0, 256], sizes = [8, 128], strides = [1, 1]} : vector<8x384xf32> to vector<8x128xf32>
    %143 = vector.extract_strided_slice %139 {offsets = [0, 0], sizes = [8, 128], strides = [1, 1]} : vector<8x384xf32> to vector<8x128xf32>
    %144 = vector.extract_strided_slice %139 {offsets = [0, 128], sizes = [8, 128], strides = [1, 1]} : vector<8x384xf32> to vector<8x128xf32>
    %145 = vector.extract_strided_slice %139 {offsets = [0, 256], sizes = [8, 128], strides = [1, 1]} : vector<8x384xf32> to vector<8x128xf32>
    %146 = arith.addf %140, %143 : vector<8x128xf32>
    %147 = arith.negf %146 : vector<8x128xf32>
    %148 = math.exp %147 : vector<8x128xf32>
    %cst_30 = arith.constant 1.000000e+00 : f32
    %149 = vector.broadcast %cst_30 : f32 to vector<8x128xf32>
    %150 = arith.addf %149, %148 : vector<8x128xf32>
    %151 = arith.divf %149, %150 : vector<8x128xf32>
    %152 = arith.addf %141, %144 : vector<8x128xf32>
    %153 = arith.negf %152 : vector<8x128xf32>
    %154 = math.exp %153 : vector<8x128xf32>
    %cst_31 = arith.constant 1.000000e+00 : f32
    %155 = vector.broadcast %cst_31 : f32 to vector<8x128xf32>
    %156 = arith.addf %155, %154 : vector<8x128xf32>
    %157 = arith.divf %155, %156 : vector<8x128xf32>
    %158 = arith.mulf %151, %145 : vector<8x128xf32>
    %159 = arith.addf %142, %158 : vector<8x128xf32>
    %160 = math.tanh %159 : vector<8x128xf32>
    %cst_32 = arith.constant 1.000000e+00 : f32
    %161 = vector.broadcast %cst_32 : f32 to vector<8x128xf32>
    %162 = arith.subf %161, %157 : vector<8x128xf32>
    %163 = arith.mulf %162, %160 : vector<8x128xf32>
    %164 = arith.mulf %157, %135 : vector<8x128xf32>
    %165 = arith.addf %163, %164 : vector<8x128xf32>
    %166 = vector.extract_strided_slice %12 {offsets = [40, 0], sizes = [8, 384], strides = [1, 1]} : vector<64x384xf32> to vector<8x384xf32>
    %cst_33 = arith.constant dense<0.000000e+00> : vector<8x384xf32>
    %167 = tpu.matmul %165, %13, %cst_33 {dimension_numbers = #tpu.dot_dimension_numbers<[1], [0], [0], [1], [0, 0, 1, 1], [], []>} : vector<8x128xf32>, vector<128x384xf32>, vector<8x384xf32> -> vector<8x384xf32>
    %168 = vector.broadcast %14 : vector<1x384xf32> to vector<8x384xf32>
    %169 = arith.addf %167, %168 : vector<8x384xf32>
    %170 = vector.extract_strided_slice %166 {offsets = [0, 0], sizes = [8, 128], strides = [1, 1]} : vector<8x384xf32> to vector<8x128xf32>
    %171 = vector.extract_strided_slice %166 {offsets = [0, 128], sizes = [8, 128], strides = [1, 1]} : vector<8x384xf32> to vector<8x128xf32>
    %172 = vector.extract_strided_slice %166 {offsets = [0, 256], sizes = [8, 128], strides = [1, 1]} : vector<8x384xf32> to vector<8x128xf32>
    %173 = vector.extract_strided_slice %169 {offsets = [0, 0], sizes = [8, 128], strides = [1, 1]} : vector<8x384xf32> to vector<8x128xf32>
    %174 = vector.extract_strided_slice %169 {offsets = [0, 128], sizes = [8, 128], strides = [1, 1]} : vector<8x384xf32> to vector<8x128xf32>
    %175 = vector.extract_strided_slice %169 {offsets = [0, 256], sizes = [8, 128], strides = [1, 1]} : vector<8x384xf32> to vector<8x128xf32>
    %176 = arith.addf %170, %173 : vector<8x128xf32>
    %177 = arith.negf %176 : vector<8x128xf32>
    %178 = math.exp %177 : vector<8x128xf32>
    %cst_34 = arith.constant 1.000000e+00 : f32
    %179 = vector.broadcast %cst_34 : f32 to vector<8x128xf32>
    %180 = arith.addf %179, %178 : vector<8x128xf32>
    %181 = arith.divf %179, %180 : vector<8x128xf32>
    %182 = arith.addf %171, %174 : vector<8x128xf32>
    %183 = arith.negf %182 : vector<8x128xf32>
    %184 = math.exp %183 : vector<8x128xf32>
    %cst_35 = arith.constant 1.000000e+00 : f32
    %185 = vector.broadcast %cst_35 : f32 to vector<8x128xf32>
    %186 = arith.addf %185, %184 : vector<8x128xf32>
    %187 = arith.divf %185, %186 : vector<8x128xf32>
    %188 = arith.mulf %181, %175 : vector<8x128xf32>
    %189 = arith.addf %172, %188 : vector<8x128xf32>
    %190 = math.tanh %189 : vector<8x128xf32>
    %cst_36 = arith.constant 1.000000e+00 : f32
    %191 = vector.broadcast %cst_36 : f32 to vector<8x128xf32>
    %192 = arith.subf %191, %187 : vector<8x128xf32>
    %193 = arith.mulf %192, %190 : vector<8x128xf32>
    %194 = arith.mulf %187, %165 : vector<8x128xf32>
    %195 = arith.addf %193, %194 : vector<8x128xf32>
    %196 = vector.extract_strided_slice %12 {offsets = [48, 0], sizes = [8, 384], strides = [1, 1]} : vector<64x384xf32> to vector<8x384xf32>
    %cst_37 = arith.constant dense<0.000000e+00> : vector<8x384xf32>
    %197 = tpu.matmul %195, %13, %cst_37 {dimension_numbers = #tpu.dot_dimension_numbers<[1], [0], [0], [1], [0, 0, 1, 1], [], []>} : vector<8x128xf32>, vector<128x384xf32>, vector<8x384xf32> -> vector<8x384xf32>
    %198 = vector.broadcast %14 : vector<1x384xf32> to vector<8x384xf32>
    %199 = arith.addf %197, %198 : vector<8x384xf32>
    %200 = vector.extract_strided_slice %196 {offsets = [0, 0], sizes = [8, 128], strides = [1, 1]} : vector<8x384xf32> to vector<8x128xf32>
    %201 = vector.extract_strided_slice %196 {offsets = [0, 128], sizes = [8, 128], strides = [1, 1]} : vector<8x384xf32> to vector<8x128xf32>
    %202 = vector.extract_strided_slice %196 {offsets = [0, 256], sizes = [8, 128], strides = [1, 1]} : vector<8x384xf32> to vector<8x128xf32>
    %203 = vector.extract_strided_slice %199 {offsets = [0, 0], sizes = [8, 128], strides = [1, 1]} : vector<8x384xf32> to vector<8x128xf32>
    %204 = vector.extract_strided_slice %199 {offsets = [0, 128], sizes = [8, 128], strides = [1, 1]} : vector<8x384xf32> to vector<8x128xf32>
    %205 = vector.extract_strided_slice %199 {offsets = [0, 256], sizes = [8, 128], strides = [1, 1]} : vector<8x384xf32> to vector<8x128xf32>
    %206 = arith.addf %200, %203 : vector<8x128xf32>
    %207 = arith.negf %206 : vector<8x128xf32>
    %208 = math.exp %207 : vector<8x128xf32>
    %cst_38 = arith.constant 1.000000e+00 : f32
    %209 = vector.broadcast %cst_38 : f32 to vector<8x128xf32>
    %210 = arith.addf %209, %208 : vector<8x128xf32>
    %211 = arith.divf %209, %210 : vector<8x128xf32>
    %212 = arith.addf %201, %204 : vector<8x128xf32>
    %213 = arith.negf %212 : vector<8x128xf32>
    %214 = math.exp %213 : vector<8x128xf32>
    %cst_39 = arith.constant 1.000000e+00 : f32
    %215 = vector.broadcast %cst_39 : f32 to vector<8x128xf32>
    %216 = arith.addf %215, %214 : vector<8x128xf32>
    %217 = arith.divf %215, %216 : vector<8x128xf32>
    %218 = arith.mulf %211, %205 : vector<8x128xf32>
    %219 = arith.addf %202, %218 : vector<8x128xf32>
    %220 = math.tanh %219 : vector<8x128xf32>
    %cst_40 = arith.constant 1.000000e+00 : f32
    %221 = vector.broadcast %cst_40 : f32 to vector<8x128xf32>
    %222 = arith.subf %221, %217 : vector<8x128xf32>
    %223 = arith.mulf %222, %220 : vector<8x128xf32>
    %224 = arith.mulf %217, %195 : vector<8x128xf32>
    %225 = arith.addf %223, %224 : vector<8x128xf32>
    %226 = vector.extract_strided_slice %12 {offsets = [56, 0], sizes = [8, 384], strides = [1, 1]} : vector<64x384xf32> to vector<8x384xf32>
    %cst_41 = arith.constant dense<0.000000e+00> : vector<8x384xf32>
    %227 = tpu.matmul %225, %13, %cst_41 {dimension_numbers = #tpu.dot_dimension_numbers<[1], [0], [0], [1], [0, 0, 1, 1], [], []>} : vector<8x128xf32>, vector<128x384xf32>, vector<8x384xf32> -> vector<8x384xf32>
    %228 = vector.broadcast %14 : vector<1x384xf32> to vector<8x384xf32>
    %229 = arith.addf %227, %228 : vector<8x384xf32>
    %230 = vector.extract_strided_slice %226 {offsets = [0, 0], sizes = [8, 128], strides = [1, 1]} : vector<8x384xf32> to vector<8x128xf32>
    %231 = vector.extract_strided_slice %226 {offsets = [0, 128], sizes = [8, 128], strides = [1, 1]} : vector<8x384xf32> to vector<8x128xf32>
    %232 = vector.extract_strided_slice %226 {offsets = [0, 256], sizes = [8, 128], strides = [1, 1]} : vector<8x384xf32> to vector<8x128xf32>
    %233 = vector.extract_strided_slice %229 {offsets = [0, 0], sizes = [8, 128], strides = [1, 1]} : vector<8x384xf32> to vector<8x128xf32>
    %234 = vector.extract_strided_slice %229 {offsets = [0, 128], sizes = [8, 128], strides = [1, 1]} : vector<8x384xf32> to vector<8x128xf32>
    %235 = vector.extract_strided_slice %229 {offsets = [0, 256], sizes = [8, 128], strides = [1, 1]} : vector<8x384xf32> to vector<8x128xf32>
    %236 = arith.addf %230, %233 : vector<8x128xf32>
    %237 = arith.negf %236 : vector<8x128xf32>
    %238 = math.exp %237 : vector<8x128xf32>
    %cst_42 = arith.constant 1.000000e+00 : f32
    %239 = vector.broadcast %cst_42 : f32 to vector<8x128xf32>
    %240 = arith.addf %239, %238 : vector<8x128xf32>
    %241 = arith.divf %239, %240 : vector<8x128xf32>
    %242 = arith.addf %231, %234 : vector<8x128xf32>
    %243 = arith.negf %242 : vector<8x128xf32>
    %244 = math.exp %243 : vector<8x128xf32>
    %cst_43 = arith.constant 1.000000e+00 : f32
    %245 = vector.broadcast %cst_43 : f32 to vector<8x128xf32>
    %246 = arith.addf %245, %244 : vector<8x128xf32>
    %247 = arith.divf %245, %246 : vector<8x128xf32>
    %248 = arith.mulf %241, %235 : vector<8x128xf32>
    %249 = arith.addf %232, %248 : vector<8x128xf32>
    %250 = math.tanh %249 : vector<8x128xf32>
    %cst_44 = arith.constant 1.000000e+00 : f32
    %251 = vector.broadcast %cst_44 : f32 to vector<8x128xf32>
    %252 = arith.subf %251, %247 : vector<8x128xf32>
    %253 = arith.mulf %252, %250 : vector<8x128xf32>
    %254 = arith.mulf %247, %225 : vector<8x128xf32>
    %255 = arith.addf %253, %254 : vector<8x128xf32>
    %c0_45 = arith.constant 0 : index
    %c0_46 = arith.constant 0 : index
    %256 = vector.load %arg6[%c0_45, %c0_46] : memref<128x128xf32, #tpu.memory_space<vmem>>, vector<128x128xf32>
    %cst_47 = arith.constant dense<0.000000e+00> : vector<8x128xf32>
    %257 = tpu.matmul %255, %256, %cst_47 {dimension_numbers = #tpu.dot_dimension_numbers<[1], [0], [0], [1], [0, 0, 1, 1], [], []>} : vector<8x128xf32>, vector<128x128xf32>, vector<8x128xf32> -> vector<8x128xf32>
    %c0_48 = arith.constant 0 : index
    %c0_49 = arith.constant 0 : index
    %258 = vector.load %arg7[%c0_48, %c0_49] : memref<1x128xf32, #tpu.memory_space<vmem>>, vector<1x128xf32>
    %259 = vector.broadcast %258 : vector<1x128xf32> to vector<8x128xf32>
    %260 = arith.addf %257, %259 : vector<8x128xf32>
    %261 = tpu.iota {dimensions = array<i32: 1>} : vector<8x128xi32>
    %c4_i32 = arith.constant 4 : i32
    %262 = vector.broadcast %c4_i32 : i32 to vector<8x128xi32>
    %263 = arith.cmpi slt, %261, %262 : vector<8x128xi32>
    %cst_50 = arith.constant -1.000000e+30 : f32
    %264 = vector.broadcast %cst_50 : f32 to vector<8x128xf32>
    %265 = arith.select %263, %260, %264 : vector<8x128xi1>, vector<8x128xf32>
    %cst_51 = arith.constant dense<0xFF800000> : vector<8xf32>
    %266 = vector.multi_reduction <maximumf>, %265, %cst_51 [1] : vector<8x128xf32> to vector<8xf32>
    %267 = vector.shape_cast %266 : vector<8xf32> to vector<8x1xf32>
    %268 = vector.broadcast %267 : vector<8x1xf32> to vector<8x128xf32>
    %269 = arith.subf %265, %268 : vector<8x128xf32>
    %270 = math.exp %269 : vector<8x128xf32>
    %cst_52 = arith.constant dense<0.000000e+00> : vector<8xf32>
    %271 = vector.multi_reduction <add>, %270, %cst_52 [1] : vector<8x128xf32> to vector<8xf32>
    %272 = vector.shape_cast %271 : vector<8xf32> to vector<8x1xf32>
    %273 = math.log %272 : vector<8x1xf32>
    %274 = vector.broadcast %273 : vector<8x1xf32> to vector<8x128xf32>
    %275 = arith.subf %269, %274 : vector<8x128xf32>
    %c0_53 = arith.constant 0 : index
    %c0_54 = arith.constant 0 : index
    %276 = vector.load %arg8[%c0_53, %c0_54] : memref<8x128xf32, #tpu.memory_space<vmem>>, vector<8x128xf32>
    tpu.vector_store %arg8[%c0_53, %c0_54], %275 {strides = array<i32>} : memref<8x128xf32, #tpu.memory_space<vmem>>, vector<8x128xf32>,
    return
  }
}

</mosaic_0001>

<bundles_post_ra>
// kernel: simple_rnn_forward.1
= control target key start
LH: loop header
LB: loop body
LE: loop exit
PB: predicated region body
PF: predicated region fallthrough
CT: control target
= control target key end

     0   :  { %v2737_v0 = vmov 0   ;;  %v37_v56 = vlaneseq  ;;  %v2738_v60 = vmov 1.0   ;;  %vm2740_vm8 = vmmov 0   ;;  %s4269_s0 = inlined_call_operand.vmem [shape: s32[64,1], index: 0, kind: input, shape index: {}]   ;;  %s4270_s1 = inlined_call_operand.vmem [shape: f32[128,128], index: 1, kind: input, shape index: {}]   ;;  %s4271_s2 = inlined_call_operand.vmem [shape: f32[128,384], index: 2, kind: input, shape index: {}]   ;;  %s4272_s3 = inlined_call_operand.vmem [shape: f32[128,384], index: 3, kind: input, shape index: {}]   ;;  %s4273_s4 = inlined_call_operand.vmem [shape: f32[1,384], index: 4, kind: input, shape index: {}]   ;;  %s4274_s5 = inlined_call_operand.vmem [shape: f32[1,384], index: 5, kind: input, shape index: {}]   ;;  %s4275_s6 = inlined_call_operand.vmem [shape: f32[128,128], index: 6, kind: input, shape index: {}]   ;;  %s4276_s7 = inlined_call_operand.vmem [shape: f32[1,128], index: 7, kind: input, shape index: {}]   ;;  %s4277_s8 = inlined_call_operand.vmem [shape: f32[8,128], index: 8, kind: output, shape index: {}]  }
   0x1   :  { %2604 = vset.pattern.permute.xlu1 %v2737_v0  ;;  %2603 = vset.pattern.permute.xlu0 %v2737_v0  ;;  %v31_v1 = vld [vmem:[%s4269_s0 + $0x10] sm:$0xff]  ;;  %v29_v2 = vld [vmem:[%s4269_s0] sm:$0xff]  ;;  %v32_v3 = vld [vmem:[%s4269_s0 + $0x18] sm:$0xff] }
   0x2   :  { %46 = vperm.xlu1 %2604, %v31_v1   ;;  %40 = vperm.xlu0 %2603, %v29_v2   ;;  %v30_v4 = vld [vmem:[%s4269_s0 + $0x8] sm:$0xff]  ;;  %v102_v5 = vld [vmem:[%s4270_s1 + $0x78] sm:$0xff]  ;;  %v101_v6 = vld [vmem:[%s4270_s1 + $0x70] sm:$0xff]  ;;  %v2952_v57 = vand.u32 127, %v37_v56 }
   0x3   :  { %2196 = vmatprep.subr.mxu0 %v102_v5  ;;  %v100_v7 = vld [vmem:[%s4270_s1 + $0x68] sm:$0xff]  ;;  %v33_v9 = vld [vmem:[%s4269_s0 + $0x20] sm:$0xff]  ;;  %v36_v11 = vld [vmem:[%s4269_s0 + $0x38] sm:$0xff] }
   0x4   :  { %2197 = vmatpush3.msra.mxu0 %v102_v5  ;;  %v34_v8 = vld [vmem:[%s4269_s0 + $0x28] sm:$0xff]  ;;  %v99_v10 = vld [vmem:[%s4270_s1 + $0x60] sm:$0xff]  ;;  %v35_v12 = vld [vmem:[%s4269_s0 + $0x30] sm:$0xff]  ;;  %4308 = vst [vmem:[#allocation2_spill] sm:$0xff] %v2952_v57 }
   0x5   :  { %2198 = vmatprep.subr.mxu0 %v101_v6  ;;  %v98_v13 = vld [vmem:[%s4270_s1 + $0x58] sm:$0xff]  ;;  %v97_v14 = vld [vmem:[%s4270_s1 + $0x50] sm:$0xff]  ;;  %v96_v15 = vld [vmem:[%s4270_s1 + $0x48] sm:$0xff] }
   0x6   :  { %49 = vperm.xlu1 %2604, %v32_v3   ;;  %43 = vperm.xlu0 %2603, %v30_v4   ;;  %v254_v16 = vld [vmem:[%s4271_s2 + $0x170] sm:$0xff]  ;;  %v253_v17 = vld [vmem:[%s4271_s2 + $0x168] sm:$0xff]  ;;  %v251_v18 = vld [vmem:[%s4271_s2 + $0x158] sm:$0xff] }
   0x7   :  { %2199 = vmatpush3.msra.mxu0 %v101_v6  ;;  %273 = vmatprep.subr.mxu1 %v254_v16  ;;  %v250_v19 = vld [vmem:[%s4271_s2 + $0x150] sm:$0xff]  ;;  %v95_v20 = vld [vmem:[%s4270_s1 + $0x40] sm:$0xff]  ;;  %v247_v22 = vld [vmem:[%s4271_s2 + $0x138] sm:$0xff] }
   0x8   :  { %2200 = vmatprep.subr.mxu0 %v100_v7  ;;  %274 = vmatpush1.msra.mxu1 %v253_v17  ;;  %v248_v21 = vld [vmem:[%s4271_s2 + $0x140] sm:$0xff]  ;;  %v94_v23 = vld [vmem:[%s4270_s1 + $0x38] sm:$0xff]  ;;  %v245_v24 = vld [vmem:[%s4271_s2 + $0x128] sm:$0xff] }
   0x9   :  { %2201 = vmatpush3.msra.mxu0 %v100_v7  ;;  %275 = vmatprep.subr.mxu1 %v251_v18  ;;  %v244_v25 = vld [vmem:[%s4271_s2 + $0x120] sm:$0xff]  ;;  %v93_v26 = vld [vmem:[%s4270_s1 + $0x30] sm:$0xff]  ;;  %v241_v28 = vld [vmem:[%s4271_s2 + $0x108] sm:$0xff] }
   0xa   :  { %55 = vperm.xlu1 %2604, %v34_v8   ;;  %52 = vperm.xlu0 %2603, %v33_v9   ;;  %v242_v27 = vld [vmem:[%s4271_s2 + $0x110] sm:$0xff]  ;;  %v92_v29 = vld [vmem:[%s4270_s1 + $0x28] sm:$0xff]  ;;  %v239_v30 = vld [vmem:[%s4271_s2 + $0xf8] sm:$0xff] }
   0xb   :  { %2202 = vmatprep.subr.mxu0 %v99_v10  ;;  %276 = vmatpush1.msra.mxu1 %v250_v19  ;;  %v238_v31 = vld [vmem:[%s4271_s2 + $0xf0] sm:$0xff]  ;;  %v91_v32 = vld [vmem:[%s4270_s1 + $0x20] sm:$0xff]  ;;  %v235_v34 = vld [vmem:[%s4271_s2 + $0xd8] sm:$0xff] }
   0xc   :  { %2203 = vmatpush3.msra.mxu0 %v99_v10  ;;  %277 = vmatprep.subr.mxu1 %v248_v21  ;;  %v236_v33 = vld [vmem:[%s4271_s2 + $0xe0] sm:$0xff]  ;;  %v90_v35 = vld [vmem:[%s4270_s1 + $0x18] sm:$0xff]  ;;  %v233_v36 = vld [vmem:[%s4271_s2 + $0xc8] sm:$0xff] }
   0xd   :  { %2204 = vmatprep.subr.mxu0 %v98_v13  ;;  %278 = vmatpush1.msra.mxu1 %v247_v22  ;;  %v232_v37 = vld [vmem:[%s4271_s2 + $0xc0] sm:$0xff]  ;;  %v89_v38 = vld [vmem:[%s4270_s1 + $0x10] sm:$0xff]  ;;  %v229_v40 = vld [vmem:[%s4271_s2 + $0xa8] sm:$0xff] }
   0xe   :  { %61 = vperm.xlu1 %2604, %v36_v11   ;;  %58 = vperm.xlu0 %2603, %v35_v12   ;;  %v230_v39 = vld [vmem:[%s4271_s2 + $0xb0] sm:$0xff]  ;;  %v88_v41 = vld [vmem:[%s4270_s1 + $0x8] sm:$0xff]  ;;  %v227_v42 = vld [vmem:[%s4271_s2 + $0x98] sm:$0xff] }
   0xf   :  { %2205 = vmatpush3.msra.mxu0 %v98_v13  ;;  %279 = vmatprep.subr.mxu1 %v245_v24  ;;  %v226_v43 = vld [vmem:[%s4271_s2 + $0x90] sm:$0xff]  ;;  %v87_v44 = vld [vmem:[%s4270_s1] sm:$0xff]  ;;  %v223_v46 = vld [vmem:[%s4271_s2 + $0x78] sm:$0xff] }
  0x10   :  { %2206 = vmatprep.subr.mxu0 %v97_v14  ;;  %280 = vmatpush1.msra.mxu1 %v244_v25  ;;  %v224_v45 = vld [vmem:[%s4271_s2 + $0x80] sm:$0xff]  ;;  %v255_v47 = vld [vmem:[%s4271_s2 + $0x178] sm:$0xff]  ;;  %v221_v48 = vld [vmem:[%s4271_s2 + $0x68] sm:$0xff] }
  0x11   :  { %2207 = vmatpush3.msra.mxu0 %v97_v14  ;;  %281 = vmatprep.subr.mxu1 %v242_v27  ;;  %v220_v49 = vld [vmem:[%s4271_s2 + $0x60] sm:$0xff]  ;;  %v218_v50 = vld [vmem:[%s4271_s2 + $0x50] sm:$0xff]  ;;  %v217_v51 = vld [vmem:[%s4271_s2 + $0x48] sm:$0xff] }
  0x12   :  { %2208 = vmatprep.subr.mxu0 %v96_v15  ;;  %282 = vmatpush1.msra.mxu1 %v241_v28  ;;  %v215_v52 = vld [vmem:[%s4271_s2 + $0x38] sm:$0xff]  ;;  %v214_v53 = vld [vmem:[%s4271_s2 + $0x30] sm:$0xff]  ;;  %v212_v54 = vld [vmem:[%s4271_s2 + $0x20] sm:$0xff] }
  0x13   :  { %2209 = vmatpush3.msra.mxu0 %v96_v15  ;;  %283 = vmatprep.subr.mxu1 %v239_v30  ;;  %v211_v55 = vld [vmem:[%s4271_s2 + $0x18] sm:$0xff]  ;;  %v252_v63 = vld [vmem:[%s4271_s2 + $0x160] sm:$0xff]  ;;  %v249_v0 = vld [vmem:[%s4271_s2 + $0x148] sm:$0xff] }
  0x14   :  { %2210 = vmatprep.subr.mxu0 %v95_v20  ;;  %284 = vmatpush1.msra.mxu1 %v238_v31  ;;  %v246_v3 = vld [vmem:[%s4271_s2 + $0x130] sm:$0xff]  ;;  %v243_v4 = vld [vmem:[%s4271_s2 + $0x118] sm:$0xff]  ;;  %v240_v6 = vld [vmem:[%s4271_s2 + $0x100] sm:$0xff] }
  0x15   :  { %2211 = vmatpush3.msra.mxu0 %v95_v20  ;;  %285 = vmatprep.subr.mxu1 %v236_v33  ;;  %v237_v8 = vld [vmem:[%s4271_s2 + $0xe8] sm:$0xff]  ;;  %v234_v9 = vld [vmem:[%s4271_s2 + $0xd0] sm:$0xff]  ;;  %v231_v10 = vld [vmem:[%s4271_s2 + $0xb8] sm:$0xff]  ;;  %v4278_v20 = vmov 0.0  }
  0x16   :  { %2212 = vmatprep.subr.mxu0 %v94_v23  ;;  %286 = vmatpush1.msra.mxu1 %v235_v34  ;;  %v228_v11 = vld [vmem:[%s4271_s2 + $0xa0] sm:$0xff]  ;;  %v225_v12 = vld [vmem:[%s4271_s2 + $0x88] sm:$0xff]  ;;  %v222_v13 = vld [vmem:[%s4271_s2 + $0x70] sm:$0xff] }
  0x17   :  { %2213 = vmatpush3.msra.mxu0 %v94_v23  ;;  %287 = vmatprep.subr.mxu1 %v233_v36  ;;  %v219_v14 = vld [vmem:[%s4271_s2 + $0x58] sm:$0xff]  ;;  %v216_v15 = vld [vmem:[%s4271_s2 + $0x40] sm:$0xff]  ;;  %v213_v16 = vld [vmem:[%s4271_s2 + $0x28] sm:$0xff] }
  0x18   :  { %2214 = vmatprep.subr.mxu0 %v93_v26  ;;  %288 = vmatpush1.msra.mxu1 %v232_v37  ;;  %v209_v17 = vld [vmem:[%s4271_s2 + $0x8] sm:$0xff]  ;;  %v208_v18 = vld [vmem:[%s4271_s2] sm:$0xff]  ;;  %v210_v19 = vld [vmem:[%s4271_s2 + $0x10] sm:$0xff] }
  0x19   :  { %2215 = vmatpush3.msra.mxu0 %v93_v26  ;;  %289 = vmatprep.subr.mxu1 %v230_v39  ;;  %v3017_v21 = vld [vmem:[%s4272_s3 + $0x170] sm:$0xff]  ;;  %v3024_v23 = vld [vmem:[%s4272_s3 + $0x168] sm:$0xff]  ;;  %v3029_v25 = vld [vmem:[%s4272_s3 + $0x158] sm:$0xff] }
  0x1a   :  { %2216 = vmatprep.subr.mxu0 %v92_v29  ;;  %290 = vmatpush1.msra.mxu1 %v229_v40  ;;  %4309 = vst [vmem:[#allocation3_spill] sm:$0xff] %v3017_v21  ;;  %v3034_v26 = vld [vmem:[%s4272_s3 + $0x150] sm:$0xff]  ;;  %v3039_v27 = vld [vmem:[%s4272_s3 + $0x178] sm:$0xff]  ;;  %v3065_v33 = vld [vmem:[%s4272_s3 + $0x120] sm:$0xff] }
  0x1b   :  { %2217 = vmatpush3.msra.mxu0 %v92_v29  ;;  %291 = vmatprep.subr.mxu1 %v227_v42  ;;  %v3045_v29 = vld [vmem:[%s4272_s3 + $0x140] sm:$0xff]  ;;  %v3052_v30 = vld [vmem:[%s4272_s3 + $0x138] sm:$0xff]  ;;  %v3077_v36 = vld [vmem:[%s4272_s3 + $0x108] sm:$0xff] }
  0x1c   :  { %2218 = vmatprep.subr.mxu0 %v91_v32  ;;  %292 = vmatpush1.msra.mxu1 %v226_v43  ;;  %v3090_v39 = vld [vmem:[%s4272_s3 + $0xf0] sm:$0xff]  ;;  %v3102_v42 = vld [vmem:[%s4272_s3 + $0xd8] sm:$0xff] }
  0x1d   :  { %2219 = vmatpush3.msra.mxu0 %v91_v32  ;;  %293 = vmatprep.subr.mxu1 %v224_v45  ;;  %v3058_v32 = vld [vmem:[%s4272_s3 + $0x128] sm:$0xff]  ;;  %v3115_v45 = vld [vmem:[%s4272_s3 + $0xc0] sm:$0xff] }
  0x1e   :  { %2220 = vmatprep.subr.mxu0 %v90_v35  ;;  %294 = vmatpush1.msra.mxu1 %v223_v46  ;;  %v3121_v46 = vld [vmem:[%s4272_s3 + $0xb0] sm:$0xff] }
  0x1f   :  { %2221 = vmatpush3.msra.mxu0 %v90_v35  ;;  %295 = vmatprep.subr.mxu1 %v221_v48  ;;  %v3071_v35 = vld [vmem:[%s4272_s3 + $0x110] sm:$0xff]  ;;  %v3134_v48 = vld [vmem:[%s4272_s3 + $0x98] sm:$0xff] }
  0x20   :  { %2222 = vmatprep.subr.mxu0 %v89_v38  ;;  %296 = vmatpush1.msra.mxu1 %v220_v49  ;;  %v3140_v49 = vld [vmem:[%s4272_s3 + $0x90] sm:$0xff] }
  0x21   :  { %2223 = vmatpush3.msra.mxu0 %v89_v38  ;;  %297 = vmatprep.subr.mxu1 %v218_v50  ;;  %v3084_v38 = vld [vmem:[%s4272_s3 + $0xf8] sm:$0xff]  ;;  %v3145_v50 = vld [vmem:[%s4272_s3 + $0x160] sm:$0xff] }
  0x22   :  { %2224 = vmatprep.subr.mxu0 %v88_v41  ;;  %298 = vmatpush1.msra.mxu1 %v217_v51  ;;  %v3152_v51 = vld [vmem:[%s4272_s3 + $0x80] sm:$0xff] }
  0x23   :  { %2225 = vmatpush3.msra.mxu0 %v88_v41  ;;  %299 = vmatprep.subr.mxu1 %v215_v52  ;;  %v3096_v41 = vld [vmem:[%s4272_s3 + $0xe0] sm:$0xff]  ;;  %v3158_v52 = vld [vmem:[%s4272_s3 + $0x78] sm:$0xff] }
  0x24   :  { %2226 = vmatprep.subr.mxu0 %v87_v44  ;;  %300 = vmatpush1.msra.mxu1 %v214_v53  ;;  %v3165_v53 = vld [vmem:[%s4272_s3 + $0x68] sm:$0xff] }
  0x25   :  { %2227 = vmatpush3.msra.mxu0 %v87_v44  ;;  %301 = vmatprep.subr.mxu1 %v212_v54  ;;  %v3109_v44 = vld [vmem:[%s4272_s3 + $0xc8] sm:$0xff]  ;;  %v3172_v54 = vld [vmem:[%s4272_s3 + $0x60] sm:$0xff] }
  0x26   :  { %2240 = vmatprep.subr.mxu0 %v255_v47  ;;  %302 = vmatpush1.msra.mxu1 %v211_v55  ;;  %v3177_v55 = vld [vmem:[%s4272_s3 + $0x148] sm:$0xff] }
  0x27   :  { %303 = vmatprep.subr.mxu1 %v209_v17  ;;  %337 = vmatprep.mubr.f32.mxu1 %v4278_v20  ;;  %v256_v17 = vld [vmem:[%s4273_s4] sm:$0x7] }
  0x28   :  { %304 = vmatpush1.msra.mxu1 %v208_v18 }
  0x29   :  { %556 = vmatprep.subr.mxu1 %v3017_v21 }
  0x7d   :  { %v47_v58 = vpop.permute.xlu1 %46  ;;  %v41_v59 = vpop.permute.xlu0 %40 }
  0x7e   :  { %vm63_vm0 = vcmp.eq.s32.totalorder %v2952_v57, %v41_v59  ;;  %vm65_vm1 = vcmp.eq.s32.totalorder %v2952_v57, %v47_v58  ;;  %v3184_v58 = vld [vmem:[%s4272_s3 + $0x50] sm:$0xff]  ;;  %v3190_v59 = vld [vmem:[%s4272_s3 + $0x48] sm:$0xff] }
  0x7f   :  { %2228 = vmatprep.mubr.msk.f32.mxu0 %vm63_vm0, %v2738_v60 }
  0x81   :  { %v50_v61 = vpop.permute.xlu1 %49  ;;  %v44_v62 = vpop.permute.xlu0 %43 }
  0x82   :  { %vm64_vm2 = vcmp.eq.s32.totalorder %v2952_v57, %v44_v62  ;;  %vm66_vm3 = vcmp.eq.s32.totalorder %v2952_v57, %v50_v61  ;;  %v3204_v61 = vld [vmem:[%s4272_s3 + $0x30] sm:$0xff] }
  0x83   :  { %2229 = vmatmul.mubr.msk.f32.vlgmr.msra.gmra.mxu0 %vm64_vm2, %v2738_v60  ;;  %4310 = vst [vmem:[#allocation4_spill] sm:$0xff] %v3204_v61  ;;  %v3209_v62 = vld [vmem:[%s4272_s3 + $0x130] sm:$0xff] }
  0x84   :  { %2231 = vmatprep.mubr.msk.f32.mxu0 %vm65_vm1, %v2738_v60  ;;  %2241 = vmatpush3.msra.mxu0 %v255_v47  ;;  %v3127_v47 = vld [vmem:[%s4272_s3 + $0xa8] sm:$0xff] }
  0x85   :  { %v56_v1 = vpop.permute.xlu1 %55  ;;  %v53_v2 = vpop.permute.xlu0 %52  ;;  %2242 = vmatprep.subr.mxu0 %v252_v63 }
  0x86   :  { %vm67_vm4 = vcmp.eq.s32.totalorder %v2952_v57, %v53_v2  ;;  %2243 = vmatpush3.msra.mxu0 %v252_v63  ;;  %vm68_vm5 = vcmp.eq.s32.totalorder %v2952_v57, %v56_v1  ;;  %v3216_v63 = vld [vmem:[%s4272_s3 + $0x20] sm:$0xff]  ;;  %v3229_v1 = vld [vmem:[%s4272_s3 + $0x8] sm:$0xff] }
  0x87   :  { %2232 = vmatmul.mubr.msk.f32.gmra.mxu0 %vm66_vm3, %v2738_v60  ;;  %2244 = vmatprep.subr.mxu0 %v249_v0  ;;  %4311 = vst [vmem:[#allocation5_spill] sm:$0xff] %v3216_v63  ;;  %4313 = vst [vmem:[#allocation7_spill] sm:$0xff] %v3229_v1  ;;  %v3236_v2 = vld [vmem:[%s4272_s3] sm:$0xff] }
  0x88   :  { %2234 = vmatprep.mubr.msk.f32.mxu0 %vm67_vm4, %v2738_v60  ;;  %2245 = vmatpush3.msra.mxu0 %v249_v0  ;;  %v3222_v0 = vld [vmem:[%s4272_s3 + $0x18] sm:$0xff]  ;;  %4314 = vst [vmem:[#allocation8_spill] sm:$0xff] %v3236_v2 }
  0x89   :  { %v59_v5 = vpop.permute.xlu0 %58  ;;  %2246 = vmatprep.subr.mxu0 %v246_v3  ;;  %v62_v7 = vpop.permute.xlu1 %61  ;;  %4312 = vst [vmem:[#allocation6_spill] sm:$0xff] %v3222_v0 }
  0x8a   :  { %vm69_vm6 = vcmp.eq.s32.totalorder %v2952_v57, %v59_v5  ;;  %2247 = vmatpush3.msra.mxu0 %v246_v3  ;;  %vm70_vm7 = vcmp.eq.s32.totalorder %v2952_v57, %v62_v7  ;;  %v3241_v3 = vld [vmem:[%s4272_s3 + $0x118] sm:$0xff]  ;;  %v3259_v5 = vld [vmem:[%s4272_s3 + $0xe8] sm:$0xff] }
  0x8b   :  { %2235 = vmatmul.mubr.msk.f32.gmra.mxu0 %vm68_vm5, %v2738_v60  ;;  %2248 = vmatprep.subr.mxu0 %v243_v4  ;;  %v3277_v7 = vld [vmem:[%s4272_s3 + $0xb8] sm:$0xff] }
  0x8c   :  { %2237 = vmatprep.mubr.msk.f32.mxu0 %vm69_vm6, %v2738_v60  ;;  %2249 = vmatpush3.msra.mxu0 %v243_v4  ;;  %v3250_v4 = vld [vmem:[%s4272_s3 + $0x100] sm:$0xff] }
  0x8d   :  { %2250 = vmatprep.subr.mxu0 %v240_v6 }
  0x8e   :  { %2251 = vmatpush3.msra.mxu0 %v240_v6  ;;  %v3268_v6 = vld [vmem:[%s4272_s3 + $0xd0] sm:$0xff] }
  0x8f   :  { %2238 = vmatmul.mubr.msk.f32.gmra.mxu0 %vm70_vm7, %v2738_v60  ;;  %2252 = vmatprep.subr.mxu0 %v237_v8  ;;  %v3197_v60 = vld [vmem:[%s4272_s3 + $0x38] sm:$0xff] }
  0x90   :  { %2253 = vmatpush3.msra.mxu0 %v237_v8  ;;  %v3286_v8 = vld [vmem:[%s4272_s3 + $0xa0] sm:$0xff] }
  0x91   :  { %2254 = vmatprep.subr.mxu0 %v234_v9 }
  0x92   :  { %2255 = vmatpush3.msra.mxu0 %v234_v9  ;;  %v3295_v9 = vld [vmem:[%s4272_s3 + $0x88] sm:$0xff] }
  0x93   :  { %2256 = vmatprep.subr.mxu0 %v231_v10 }
  0x94   :  { %2257 = vmatpush3.msra.mxu0 %v231_v10  ;;  %v3304_v10 = vld [vmem:[%s4272_s3 + $0x70] sm:$0xff] }
  0x95   :  { %2258 = vmatprep.subr.mxu0 %v228_v11 }
  0x96   :  { %2259 = vmatpush3.msra.mxu0 %v228_v11  ;;  %v3313_v11 = vld [vmem:[%s4272_s3 + $0x58] sm:$0xff] }
  0x97   :  { %2260 = vmatprep.subr.mxu0 %v225_v12 }
  0x98   :  { %2261 = vmatpush3.msra.mxu0 %v225_v12  ;;  %v3322_v12 = vld [vmem:[%s4272_s3 + $0x40] sm:$0xff] }
  0x99   :  { %2262 = vmatprep.subr.mxu0 %v222_v13  ;;  %4315 = vst [vmem:[#allocation9_spill] sm:$0xff] %v3322_v12 }
  0x9a   :  { %2263 = vmatpush3.msra.mxu0 %v222_v13  ;;  %v3331_v13 = vld [vmem:[%s4272_s3 + $0x28] sm:$0xff] }
  0x9b   :  { %2264 = vmatprep.subr.mxu0 %v219_v14  ;;  %4316 = vst [vmem:[#allocation10_spill] sm:$0xff] %v3331_v13 }
  0x9c   :  { %2265 = vmatpush3.msra.mxu0 %v219_v14  ;;  %v3340_v14 = vld [vmem:[%s4272_s3 + $0x10] sm:$0xff] }
  0x9d   :  { %2266 = vmatprep.subr.mxu0 %v216_v15  ;;  %4317 = vst [vmem:[#allocation11_spill] sm:$0xff] %v3340_v14 }
  0x9e   :  { %2267 = vmatpush3.msra.mxu0 %v216_v15  ;;  %v3400_v15 = vshrl.u32 %v37_v56, 7 }
  0x9f   :  { %2268 = vmatprep.subr.mxu0 %v213_v16 }
  0xa0   :  { %2269 = vmatpush3.msra.mxu0 %v213_v16  ;;  %v4281_v16 = vsub.s32 2, %v3400_v15 }
  0xa1   :  { %2270 = vmatprep.subr.mxu0 %v210_v19 }
  0xa2   :  { %2271 = vmatpush3.msra.mxu0 %v210_v19  ;;  %v3408_v18 = vrot.slane %v256_v17, %v4281_v16  ;;  %v260_v19 = vsub.s32 0, %v3400_v15 }
  0xa3   :  { %2284 = vmatprep.subr.mxu0 %v4278_v20 }
 0x143   :  { %v2230_v22 = vpop.f32.mrf.mxu0 }
 0x145   :  { %v169_v24 = vpop.f32.mrf.mxu0 }
 0x146   :  { %338 = vmatmul.mubr.f32.vlgmr.msra.gmra.mxu1 %v169_v24  ;;  %2272 = vmatprep.mubr.f32.mxu0 %v169_v24 }
 0x147   :  { %557 = vmatpush1.msra.mxu1 %v3024_v23  ;;  %v2233_v28 = vpop.f32.mrf.mxu0  ;;  %2273 = vmatmul.mubr.f32.vlgmr.msra.gmra.mxu0 %v2230_v22 }
 0x148   :  { %558 = vmatprep.subr.mxu1 %v3029_v25  ;;  %343 = vmatprep.mubr.f32.mxu1 %v4278_v20 }
 0x149   :  { %559 = vmatpush1.msra.mxu1 %v3034_v26  ;;  %v179_v31 = vpop.f32.mrf.mxu0  ;;  %2285 = vmatpush3.msra.mxu0 %v3039_v27 }
 0x14a   :  { %560 = vmatprep.subr.mxu1 %v3045_v29  ;;  %344 = vmatmul.mubr.f32.gmra.mxu1 %v2230_v22 }
 0x14b   :  { %2275 = vmatprep.mubr.f32.mxu0 %v179_v31  ;;  %561 = vmatpush1.msra.mxu1 %v3052_v30  ;;  %v2236_v34 = vpop.f32.mrf.mxu0 }
 0x14c   :  { %2276 = vmatmul.mubr.f32.gmra.mxu0 %v2233_v28  ;;  %562 = vmatprep.subr.mxu1 %v3058_v32 }
 0x14d   :  { %563 = vmatpush1.msra.mxu1 %v3065_v33  ;;  %v189_v37 = vpop.f32.mrf.mxu0  ;;  %349 = vmatprep.mubr.f32.mxu1 %v4278_v20 }
 0x14e   :  { %564 = vmatprep.subr.mxu1 %v3071_v35  ;;  %350 = vmatmul.mubr.f32.gmra.mxu1 %v179_v31 }
 0x14f   :  { %2278 = vmatprep.mubr.f32.mxu0 %v189_v37  ;;  %565 = vmatpush1.msra.mxu1 %v3077_v36  ;;  %v2239_v40 = vpop.f32.mrf.mxu0 }
 0x150   :  { %2279 = vmatmul.mubr.f32.gmra.mxu0 %v2236_v34  ;;  %566 = vmatprep.subr.mxu1 %v3084_v38 }
 0x151   :  { %567 = vmatpush1.msra.mxu1 %v3090_v39  ;;  %v199_v43 = vpop.f32.mrf.mxu0  ;;  %355 = vmatprep.mubr.f32.mxu1 %v4278_v20 }
 0x152   :  { %568 = vmatprep.subr.mxu1 %v3096_v41  ;;  %356 = vmatmul.mubr.f32.gmra.mxu1 %v2233_v28  ;;  %v264_v28 = vsub.s32 1, %v3400_v15 }
 0x153   :  { %2281 = vmatprep.mubr.f32.mxu0 %v199_v43  ;;  %569 = vmatpush1.msra.mxu1 %v3102_v42 }
 0x154   :  { %2282 = vmatmul.mubr.f32.gmra.mxu0 %v2239_v40  ;;  %570 = vmatprep.subr.mxu1 %v3109_v44 }
 0x155   :  { %571 = vmatpush1.msra.mxu1 %v3115_v45  ;;  %361 = vmatprep.mubr.f32.mxu1 %v4278_v20 }
 0x156   :  { %572 = vmatprep.subr.mxu1 %v3121_v46  ;;  %362 = vmatmul.mubr.f32.gmra.mxu1 %v189_v37 }
 0x157   :  { %573 = vmatpush1.msra.mxu1 %v3127_v47  ;;  %367 = vmatprep.mubr.f32.mxu1 %v4278_v20 }
 0x158   :  { %574 = vmatprep.subr.mxu1 %v3134_v48  ;;  %2286 = vmatprep.subr.mxu0 %v4278_v20 }
 0x159   :  { %575 = vmatpush1.msra.mxu1 %v3140_v49  ;;  %2287 = vmatpush3.msra.mxu0 %v3145_v50 }
 0x15a   :  { %576 = vmatprep.subr.mxu1 %v3152_v51  ;;  %368 = vmatmul.mubr.f32.gmra.mxu1 %v2236_v34  ;;  %v261_v34 = vrot.slane %v256_v17, %v260_v19 }
 0x15b   :  { %577 = vmatpush1.msra.mxu1 %v3158_v52  ;;  %373 = vmatprep.mubr.f32.mxu1 %v4278_v20 }
 0x15c   :  { %578 = vmatprep.subr.mxu1 %v3165_v53  ;;  %2288 = vmatprep.subr.mxu0 %v4278_v20 }
 0x15d   :  { %579 = vmatpush1.msra.mxu1 %v3172_v54  ;;  %2289 = vmatpush3.msra.mxu0 %v3177_v55 }
 0x15e   :  { %580 = vmatprep.subr.mxu1 %v3184_v58  ;;  %374 = vmatmul.mubr.f32.gmra.mxu1 %v199_v43  ;;  %v265_v43 = vrot.slane %v256_v17, %v264_v28 }
 0x15f   :  { %581 = vmatpush1.msra.mxu1 %v3190_v59  ;;  %379 = vmatprep.mubr.f32.mxu1 %v4278_v20 }
 0x160   :  { %582 = vmatprep.subr.mxu1 %v3197_v60  ;;  %2290 = vmatprep.subr.mxu0 %v4278_v20 }
 0x161   :  { %583 = vmatpush1.msra.mxu1 %v3204_v61  ;;  %2291 = vmatpush3.msra.mxu0 %v3209_v62 }
 0x162   :  { %584 = vmatprep.subr.mxu1 %v3216_v63  ;;  %380 = vmatmul.mubr.f32.gmra.mxu1 %v2239_v40 }
 0x163   :  { %585 = vmatpush1.msra.mxu1 %v3222_v0  ;;  %620 = vmatprep.mubr.f32.mxu1 %v4278_v20 }
 0x164   :  { %586 = vmatprep.subr.mxu1 %v3229_v1  ;;  %2292 = vmatprep.subr.mxu0 %v4278_v20 }
 0x165   :  { %587 = vmatpush1.msra.mxu1 %v3236_v2  ;;  %2293 = vmatpush3.msra.mxu0 %v3241_v3 }
 0x166   :  { %621 = vmatmul.mubr.f32.vlgmr.msra.gmra.mxu1 %v4278_v20  ;;  %2294 = vmatprep.subr.mxu0 %v4278_v20 }
 0x167   :  { %2295 = vmatpush3.msra.mxu0 %v3250_v4  ;;  %2316 = vmatprep.mubr.msk.f32.mxu0 %vm2740_vm8, %v4278_v20 }
 0x168   :  { %2296 = vmatprep.subr.mxu0 %v4278_v20  ;;  %718 = vmatprep.subr.mxu1 %v3017_v21 }
 0x169   :  { %2297 = vmatpush3.msra.mxu0 %v3259_v5  ;;  %719 = vmatpush1.msra.mxu1 %v3024_v23 }
 0x16a   :  { %2298 = vmatprep.subr.mxu0 %v4278_v20  ;;  %720 = vmatprep.subr.mxu1 %v3029_v25 }
 0x16b   :  { %2299 = vmatpush3.msra.mxu0 %v3268_v6  ;;  %721 = vmatpush1.msra.mxu1 %v3034_v26 }
 0x16c   :  { %2300 = vmatprep.subr.mxu0 %v4278_v20  ;;  %722 = vmatprep.subr.mxu1 %v3045_v29 }
 0x16d   :  { %2301 = vmatpush3.msra.mxu0 %v3277_v7  ;;  %723 = vmatpush1.msra.mxu1 %v3052_v30 }
 0x16e   :  { %2302 = vmatprep.subr.mxu0 %v4278_v20  ;;  %724 = vmatprep.subr.mxu1 %v3058_v32 }
 0x16f   :  { %2303 = vmatpush3.msra.mxu0 %v3286_v8  ;;  %725 = vmatpush1.msra.mxu1 %v3065_v33 }
 0x170   :  { %2304 = vmatprep.subr.mxu0 %v4278_v20  ;;  %726 = vmatprep.subr.mxu1 %v3071_v35 }
 0x171   :  { %2305 = vmatpush3.msra.mxu0 %v3295_v9  ;;  %727 = vmatpush1.msra.mxu1 %v3077_v36 }
 0x172   :  { %2306 = vmatprep.subr.mxu0 %v4278_v20  ;;  %728 = vmatprep.subr.mxu1 %v3084_v38 }
 0x173   :  { %2307 = vmatpush3.msra.mxu0 %v3304_v10  ;;  %729 = vmatpush1.msra.mxu1 %v3090_v39 }
 0x174   :  { %2308 = vmatprep.subr.mxu0 %v4278_v20  ;;  %730 = vmatprep.subr.mxu1 %v3096_v41 }
 0x175   :  { %2309 = vmatpush3.msra.mxu0 %v3313_v11  ;;  %731 = vmatpush1.msra.mxu1 %v3102_v42 }
 0x176   :  { %2310 = vmatprep.subr.mxu0 %v4278_v20  ;;  %732 = vmatprep.subr.mxu1 %v3109_v44 }
 0x177   :  { %2311 = vmatpush3.msra.mxu0 %v3322_v12  ;;  %733 = vmatpush1.msra.mxu1 %v3115_v45 }
 0x178   :  { %2312 = vmatprep.subr.mxu0 %v4278_v20  ;;  %734 = vmatprep.subr.mxu1 %v3121_v46 }
 0x179   :  { %2313 = vmatpush3.msra.mxu0 %v3331_v13  ;;  %735 = vmatpush1.msra.mxu1 %v3127_v47 }
 0x17a   :  { %2314 = vmatprep.subr.mxu0 %v4278_v20  ;;  %736 = vmatprep.subr.mxu1 %v3134_v48 }
 0x17b   :  { %2315 = vmatpush3.msra.mxu0 %v3340_v14  ;;  %737 = vmatpush1.msra.mxu1 %v3140_v49 }
 0x17c   :  { %2317 = vmatmul.mubr.f32.vlgmr.msra.gmra.mxu0 %v4278_v20  ;;  %2319 = vmatprep.subr.mxu0 %v4278_v20 }
 0x17d   :  { %2320 = vmatpush3.msra.mxu0 %v3039_v27  ;;  %738 = vmatprep.subr.mxu1 %v3152_v51 }
 0x17e   :  { %2321 = vmatprep.subr.mxu0 %v4278_v20  ;;  %739 = vmatpush1.msra.mxu1 %v3158_v52 }
 0x17f   :  { %2322 = vmatpush3.msra.mxu0 %v3145_v50  ;;  %740 = vmatprep.subr.mxu1 %v3165_v53 }
 0x180   :  { %2323 = vmatprep.subr.mxu0 %v4278_v20  ;;  %741 = vmatpush1.msra.mxu1 %v3172_v54 }
 0x181   :  { %2324 = vmatpush3.msra.mxu0 %v3177_v55  ;;  %742 = vmatprep.subr.mxu1 %v3184_v58 }
 0x182   :  { %2325 = vmatprep.subr.mxu0 %v4278_v20  ;;  %743 = vmatpush1.msra.mxu1 %v3190_v59 }
 0x183   :  { %2326 = vmatpush3.msra.mxu0 %v3209_v62  ;;  %744 = vmatprep.subr.mxu1 %v3197_v60 }
 0x184   :  { %2327 = vmatprep.subr.mxu0 %v4278_v20  ;;  %745 = vmatpush1.msra.mxu1 %v3204_v61 }
 0x185   :  { %2328 = vmatpush3.msra.mxu0 %v3241_v3  ;;  %746 = vmatprep.subr.mxu1 %v3216_v63 }
 0x186   :  { %2329 = vmatprep.subr.mxu0 %v4278_v20  ;;  %747 = vmatpush1.msra.mxu1 %v3222_v0 }
 0x187   :  { %2330 = vmatpush3.msra.mxu0 %v3250_v4  ;;  %748 = vmatprep.subr.mxu1 %v3229_v1 }
 0x188   :  { %2331 = vmatprep.subr.mxu0 %v4278_v20  ;;  %749 = vmatpush1.msra.mxu1 %v3236_v2 }
 0x189   :  { %2332 = vmatpush3.msra.mxu0 %v3259_v5  ;;  %782 = vmatprep.mubr.f32.mxu1 %v4278_v20 }
 0x18a   :  { %2333 = vmatprep.subr.mxu0 %v4278_v20  ;;  %2351 = vmatprep.mubr.msk.f32.mxu0 %vm2740_vm8, %v4278_v20 }
 0x18b   :  { %2334 = vmatpush3.msra.mxu0 %v3268_v6  ;;  %880 = vmatprep.subr.mxu1 %v3017_v21 }
 0x18c   :  { %2335 = vmatprep.subr.mxu0 %v4278_v20 }
 0x18d   :  { %2336 = vmatpush3.msra.mxu0 %v3277_v7 }
 0x18e   :  { %2337 = vmatprep.subr.mxu0 %v4278_v20 }
 0x18f   :  { %2338 = vmatpush3.msra.mxu0 %v3286_v8 }
 0x190   :  { %2339 = vmatprep.subr.mxu0 %v4278_v20 }
 0x191   :  { %2340 = vmatpush3.msra.mxu0 %v3295_v9 }
 0x192   :  { %2341 = vmatprep.subr.mxu0 %v4278_v20 }
 0x193   :  { %2342 = vmatpush3.msra.mxu0 %v3304_v10 }
 0x194   :  { %2343 = vmatprep.subr.mxu0 %v4278_v20 }
 0x195   :  { %2344 = vmatpush3.msra.mxu0 %v3313_v11 }
 0x196   :  { %2345 = vmatprep.subr.mxu0 %v4278_v20 }
 0x197   :  { %2346 = vmatpush3.msra.mxu0 %v3322_v12 }
 0x198   :  { %2347 = vmatprep.subr.mxu0 %v4278_v20 }
 0x199   :  { %2348 = vmatpush3.msra.mxu0 %v3331_v13 }
 0x19a   :  { %2349 = vmatprep.subr.mxu0 %v4278_v20 }
 0x19b   :  { %2350 = vmatpush3.msra.mxu0 %v3340_v14 }
 0x19c   :  { %2354 = vmatprep.subr.mxu0 %v4278_v20 }
 0x206   :  { %v339_v22 = vpop.f32.mrf.mxu1 }
 0x207   :  { %v2274_v24 = vpop.f32.mrf.mxu0 }
 0x208   :  { %v3413_v31 = vadd.f32 %v2274_v24, %v3408_v18  ;;  %v341_v56 = vpop.f32.mrf.mxu1 }
 0x209   :  { %v3415_v37 = vpop.f32.mrf.mxu0 }
 0x20a   :  { %4318 = vst [vmem:[#allocation12_spill] sm:$0xff] %v3413_v31  ;;  %v345_v40 = vpop.f32.mrf.mxu1 }
 0x20b   :  { %v3417_v20 = vadd.f32 %v345_v40, %v261_v34 }
 0x20c   :  { %v2277_v57 = vpop.f32.mrf.mxu0  ;;  %v347_v16 = vpop.f32.mrf.mxu1 }
 0x20d   :  { %4319 = vst [vmem:[#allocation13_spill] sm:$0xff] %v3417_v20  ;;  %v3420_v21 = vadd.f32 %v2277_v57, %v3408_v18  ;;  %v3422_v14 = vadd.f32 %v347_v16, %v265_v43 }
 0x20e   :  { %v462_v2 = vpop.f32.mrf.mxu0  ;;  %v351_v1 = vpop.f32.mrf.mxu1 }
 0x20f   :  { %4320 = vst [vmem:[#allocation14_spill] sm:$0xff] %v3420_v21  ;;  %4321 = vst [vmem:[#allocation15_spill] sm:$0xff] %v3422_v14  ;;  %v3425_v24 = vadd.f32 %v462_v2, %v3408_v18  ;;  %v3427_v31 = vadd.f32 %v351_v1, %v261_v34 }
 0x210   :  { %v2280_v13 = vpop.f32.mrf.mxu0  ;;  %v353_v0 = vpop.f32.mrf.mxu1 }
 0x211   :  { %4322 = vst [vmem:[#allocation16_spill] sm:$0xff] %v3425_v24  ;;  %4323 = vst [vmem:[#allocation17_spill] sm:$0xff] %v3427_v31  ;;  %v3430_v17 = vadd.f32 %v2280_v13, %v3408_v18  ;;  %v3432_v40 = vadd.f32 %v353_v0, %v265_v43 }
 0x212   :  { %v472_v20 = vpop.f32.mrf.mxu0  ;;  %v357_v63 = vpop.f32.mrf.mxu1 }
 0x213   :  { %4324 = vst [vmem:[#allocation18_spill] sm:$0xff] %v3430_v17  ;;  %4325 = vst [vmem:[#allocation19_spill] sm:$0xff] %v3432_v40  ;;  %v3435_v57 = vadd.f32 %v472_v20, %v3408_v18  ;;  %v3437_v16 = vadd.f32 %v357_v63, %v261_v34 }
 0x214   :  { %v2283_v21 = vpop.f32.mrf.mxu0  ;;  %v359_v14 = vpop.f32.mrf.mxu1 }
 0x215   :  { %4326 = vst [vmem:[#allocation20_spill] sm:$0xff] %v3435_v57  ;;  %4327 = vst [vmem:[#allocation21_spill] sm:$0xff] %v3437_v16  ;;  %v3440_v2 = vadd.f32 %v2283_v21, %v3408_v18  ;;  %v3442_v1 = vadd.f32 %v359_v14, %v265_v43 }
 0x216   :  { %v482_v24 = vpop.f32.mrf.mxu0  ;;  %v363_v31 = vpop.f32.mrf.mxu1 }
 0x217   :  { %4328 = vst [vmem:[#allocation22_spill] sm:$0xff] %v3440_v2  ;;  %4329 = vst [vmem:[#allocation23_spill] sm:$0xff] %v3442_v1  ;;  %v3445_v13 = vadd.f32 %v482_v24, %v3408_v18  ;;  %v3447_v0 = vadd.f32 %v363_v31, %v261_v34  ;;  %v539_v24 = vld [vmem:[%s4274_s5] sm:$0x7] }
 0x218   :  { %v365_v17 = vpop.f32.mrf.mxu1 }
 0x219   :  { %4330 = vst [vmem:[#allocation24_spill] sm:$0xff] %v3445_v13  ;;  %4331 = vst [vmem:[#allocation25_spill] sm:$0xff] %v3447_v0  ;;  %v3449_v40 = vadd.f32 %v365_v17, %v265_v43  ;;  %v3464_v17 = vrot.slane %v539_v24, %v260_v19 }
 0x21a   :  { %v369_v20 = vpop.f32.mrf.mxu1 }
 0x21b   :  { %4332 = vst [vmem:[#allocation26_spill] sm:$0xff] %v3449_v40  ;;  %v3451_v63 = vadd.f32 %v369_v20, %v261_v34  ;;  %4338 = vst [vmem:[#allocation32_spill] sm:$0xff] %v3464_v17 }
 0x21c   :  { %v371_v57 = vpop.f32.mrf.mxu1 }
 0x21d   :  { %4333 = vst [vmem:[#allocation27_spill] sm:$0xff] %v3451_v63  ;;  %v3453_v16 = vadd.f32 %v371_v57, %v265_v43 }
 0x21e   :  { %v375_v21 = vpop.f32.mrf.mxu1 }
 0x21f   :  { %4334 = vst [vmem:[#allocation28_spill] sm:$0xff] %v3453_v16  ;;  %v3455_v2 = vadd.f32 %v375_v21, %v261_v34  ;;  %v340_v16 = vadd.f32 %v339_v22, %v261_v34  ;;  %v4340_v22 = vsub.s32 2, %v3400_v15 }
 0x220   :  { %v377_v14 = vpop.f32.mrf.mxu1 }
 0x221   :  { %4335 = vst [vmem:[#allocation29_spill] sm:$0xff] %v3455_v2  ;;  %v3460_v13 = vadd.f32 %v377_v14, %v265_v43  ;;  %v3469_v2 = vrot.slane %v539_v24, %v264_v28 }
 0x222   :  { %v381_v31 = vpop.f32.mrf.mxu1 }
 0x223   :  { %4336 = vst [vmem:[#allocation30_spill] sm:$0xff] %v3460_v13  ;;  %v3462_v0 = vadd.f32 %v381_v31, %v261_v34  ;;  %v342_v13 = vadd.f32 %v341_v56, %v265_v43  ;;  %v3474_v34 = vrot.slane %v539_v24, %v4340_v22  ;;  %v4343_v24 = vld [vmem:[#allocation9_spill] sm:$0xff]  ;;  %v4349_v22 = vld [vmem:[#allocation11_spill] sm:$0xff] }
 0x224   :  { %v383_v20 = vpop.f32.mrf.mxu1 }
 0x225   :  { %4337 = vst [vmem:[#allocation31_spill] sm:$0xff] %v3462_v0  ;;  %v3466_v63 = vadd.f32 %v383_v20, %v265_v43 }
 0x226   :  { %v622_v57 = vpop.f32.mrf.mxu1 }
 0x227   :  { %4339 = vst [vmem:[#allocation33_spill] sm:$0xff] %v3466_v63  ;;  %v623_v21 = vadd.f32 %v622_v57, %v3464_v17 }
 0x228   :  { %v624_v40 = vpop.f32.mrf.mxu1 }
 0x229   :  { %v697_v1 = vadd.f32 %v623_v21, %v340_v16  ;;  %v625_v14 = vadd.f32 %v624_v40, %v3469_v2  ;;  %v4344_v21 = vld [vmem:[#allocation5_spill] sm:$0xff] }
 0x22b   :  { %v1978_v12 = vmul.f32 -1.442695, %v697_v1  ;;  %v704_v31 = vadd.f32 %v625_v14, %v342_v13  ;;  %v4345_v14 = vld [vmem:[#allocation6_spill] sm:$0xff] }
 0x22d   :  { %2605 = vpow2.f32 %v1978_v12  ;;  %v1979_v0 = vmul.f32 -1.442695, %v704_v31  ;;  %v453_v12 = vadd.f32 %v3415_v37, %v3408_v18  ;;  %v4341_v18 = vmov 0.0   ;;  %v4342_v37 = vld [vmem:[#allocation4_spill] sm:$0xff]  ;;  %v4346_v31 = vld [vmem:[#allocation10_spill] sm:$0xff] }
 0x22f   :  { %2607 = vpow2.f32 %v1979_v0 }
 0x23a   :  { %v2606_v19 = vpop.eup %2605 }
 0x23b   :  { %v701_v61 = vadd.f32 1.0, %v2606_v19  ;;  %v4347_v19 = vld [vmem:[#allocation7_spill] sm:$0xff] }
 0x23c   :  { %v693_v20 = vpop.f32.mrf.mxu0  ;;  %v2608_v28 = vpop.eup %2607 }
 0x23d   :  { %2609 = vrcp.f32 %v701_v61  ;;  %v708_v57 = vadd.f32 1.0, %v2608_v28  ;;  %v694_v16 = vadd.f32 %v693_v20, %v3474_v34  ;;  %v4348_v20 = vld [vmem:[#allocation8_spill] sm:$0xff]  ;;  %v4350_v28 = vld [vmem:[#allocation3_spill] sm:$0xff] }
 0x23e   :  { %v2318_v63 = vpop.f32.mrf.mxu0 }
 0x23f   :  { %2611 = vrcp.f32 %v708_v57 }
 0x24a   :  { %v2610_v1 = vpop.eup %2609 }
 0x24b   :  { %v711_v56 = vmul.f32 %v2610_v1, %v694_v16 }
 0x24c   :  { %v2612_v40 = vpop.eup %2611 }
 0x24d   :  { %v712_v43 = vadd.f32 %v711_v56, %v453_v12  ;;  %v714_v13 = vsub.f32 1.0, %v2612_v40  ;;  %v716_v63 = vmul.f32 0.0, %v2612_v40 }
 0x24f   :  { %2613 = vtanh.f32 %v712_v43  ;;  %v4351_v43 = vld [vmem:[#allocation13_spill] sm:$0xff] }
 0x25c   :  { %v2614_v61 = vpop.eup %2613 }
 0x25d   :  { %v715_v0 = vmul.f32 %v2614_v61, %v714_v13 }
 0x25f   :  { %v3479_v15 = vadd.f32 %v716_v63, %v715_v0  ;;  %v4352_v0 = vld [vmem:[#allocation15_spill] sm:$0xff] }
 0x261   :  { %783 = vmatmul.mubr.f32.vlgmr.msra.gmra.mxu1 %v3479_v15  ;;  %2352 = vmatmul.mubr.f32.vlgmr.msra.gmra.mxu0 %v3479_v15 }
 0x262   :  { %881 = vmatpush1.msra.mxu1 %v3024_v23  ;;  %2355 = vmatpush3.msra.mxu0 %v3039_v27 }
 0x263   :  { %882 = vmatprep.subr.mxu1 %v3029_v25  ;;  %2356 = vmatprep.subr.mxu0 %v4341_v18 }
 0x264   :  { %883 = vmatpush1.msra.mxu1 %v3034_v26  ;;  %2357 = vmatpush3.msra.mxu0 %v3145_v50 }
 0x265   :  { %884 = vmatprep.subr.mxu1 %v3045_v29  ;;  %2358 = vmatprep.subr.mxu0 %v4341_v18 }
 0x266   :  { %885 = vmatpush1.msra.mxu1 %v3052_v30  ;;  %2359 = vmatpush3.msra.mxu0 %v3177_v55 }
 0x267   :  { %886 = vmatprep.subr.mxu1 %v3058_v32  ;;  %2360 = vmatprep.subr.mxu0 %v4341_v18 }
 0x268   :  { %887 = vmatpush1.msra.mxu1 %v3065_v33  ;;  %2361 = vmatpush3.msra.mxu0 %v3209_v62 }
 0x269   :  { %888 = vmatprep.subr.mxu1 %v3071_v35  ;;  %2362 = vmatprep.subr.mxu0 %v4341_v18 }
 0x26a   :  { %889 = vmatpush1.msra.mxu1 %v3077_v36  ;;  %2363 = vmatpush3.msra.mxu0 %v3241_v3 }
 0x26b   :  { %890 = vmatprep.subr.mxu1 %v3084_v38  ;;  %2364 = vmatprep.subr.mxu0 %v4341_v18 }
 0x26c   :  { %891 = vmatpush1.msra.mxu1 %v3090_v39  ;;  %2365 = vmatpush3.msra.mxu0 %v3250_v4 }
 0x26d   :  { %892 = vmatprep.subr.mxu1 %v3096_v41  ;;  %2366 = vmatprep.subr.mxu0 %v4341_v18 }
 0x26e   :  { %893 = vmatpush1.msra.mxu1 %v3102_v42  ;;  %2367 = vmatpush3.msra.mxu0 %v3259_v5 }
 0x26f   :  { %894 = vmatprep.subr.mxu1 %v3109_v44  ;;  %2368 = vmatprep.subr.mxu0 %v4341_v18 }
 0x270   :  { %895 = vmatpush1.msra.mxu1 %v3115_v45  ;;  %2369 = vmatpush3.msra.mxu0 %v3268_v6 }
 0x271   :  { %896 = vmatprep.subr.mxu1 %v3121_v46  ;;  %2370 = vmatprep.subr.mxu0 %v4341_v18 }
 0x272   :  { %897 = vmatpush1.msra.mxu1 %v3127_v47  ;;  %2371 = vmatpush3.msra.mxu0 %v3277_v7 }
 0x273   :  { %898 = vmatprep.subr.mxu1 %v3134_v48  ;;  %2372 = vmatprep.subr.mxu0 %v4341_v18 }
 0x274   :  { %899 = vmatpush1.msra.mxu1 %v3140_v49  ;;  %2373 = vmatpush3.msra.mxu0 %v3286_v8 }
 0x275   :  { %900 = vmatprep.subr.mxu1 %v3152_v51  ;;  %2374 = vmatprep.subr.mxu0 %v4341_v18 }
 0x276   :  { %901 = vmatpush1.msra.mxu1 %v3158_v52  ;;  %2375 = vmatpush3.msra.mxu0 %v3295_v9 }
 0x277   :  { %902 = vmatprep.subr.mxu1 %v3165_v53  ;;  %2376 = vmatprep.subr.mxu0 %v4341_v18 }
 0x278   :  { %903 = vmatpush1.msra.mxu1 %v3172_v54  ;;  %2377 = vmatpush3.msra.mxu0 %v3304_v10 }
 0x279   :  { %904 = vmatprep.subr.mxu1 %v3184_v58  ;;  %2378 = vmatprep.subr.mxu0 %v4341_v18 }
 0x27a   :  { %905 = vmatpush1.msra.mxu1 %v3190_v59  ;;  %2379 = vmatpush3.msra.mxu0 %v3313_v11 }
 0x27b   :  { %906 = vmatprep.subr.mxu1 %v3197_v60  ;;  %2380 = vmatprep.subr.mxu0 %v4341_v18 }
 0x27c   :  { %907 = vmatpush1.msra.mxu1 %v4342_v37  ;;  %2381 = vmatpush3.msra.mxu0 %v4343_v24 }
 0x27d   :  { %908 = vmatprep.subr.mxu1 %v4344_v21  ;;  %2382 = vmatprep.subr.mxu0 %v4341_v18 }
 0x27e   :  { %909 = vmatpush1.msra.mxu1 %v4345_v14  ;;  %2383 = vmatpush3.msra.mxu0 %v4346_v31 }
 0x27f   :  { %910 = vmatprep.subr.mxu1 %v4347_v19  ;;  %2384 = vmatprep.subr.mxu0 %v4341_v18 }
 0x280   :  { %911 = vmatpush1.msra.mxu1 %v4348_v20  ;;  %944 = vmatprep.mubr.f32.mxu1 %v4341_v18 }
 0x281   :  { %2385 = vmatpush3.msra.mxu0 %v4349_v22  ;;  %2386 = vmatprep.mubr.msk.f32.mxu0 %vm2740_vm8, %v4341_v18 }
 0x282   :  { %1042 = vmatprep.subr.mxu1 %v4350_v28  ;;  %2389 = vmatprep.subr.mxu0 %v4341_v18 }
 0x321   :  { %v784_v57 = vpop.f32.mrf.mxu1  ;;  %v855_v16 = vpop.f32.mrf.mxu0 }
 0x322   :  { %v785_v1 = vadd.f32 %v784_v57, %v3464_v17  ;;  %v856_v14 = vadd.f32 %v855_v16, %v3474_v34 }
 0x323   :  { %v786_v12 = vpop.f32.mrf.mxu1  ;;  %v2353_v56 = vpop.f32.mrf.mxu0 }
 0x324   :  { %v859_v40 = vadd.f32 %v785_v1, %v4351_v43  ;;  %v787_v61 = vadd.f32 %v786_v12, %v3469_v2  ;;  %v4353_v56 = vld [vmem:[#allocation12_spill] sm:$0xff] }
 0x326   :  { %v1980_v13 = vmul.f32 -1.442695, %v859_v40  ;;  %v866_v63 = vadd.f32 %v787_v61, %v4352_v0  ;;  %v4360_v0 = vld [vmem:[#allocation32_spill] sm:$0xff] }
 0x328   :  { %2615 = vpow2.f32 %v1980_v13  ;;  %v1981_v22 = vmul.f32 -1.442695, %v866_v63 }
 0x32a   :  { %2617 = vpow2.f32 %v1981_v22 }
 0x335   :  { %v2616_v20 = vpop.eup %2615 }
 0x336   :  { %v863_v28 = vadd.f32 1.0, %v2616_v20  ;;  %v4359_v20 = vld [vmem:[#allocation3_spill] sm:$0xff] }
 0x337   :  { %v2618_v19 = vpop.eup %2617 }
 0x338   :  { %2619 = vrcp.f32 %v863_v28  ;;  %v870_v31 = vadd.f32 1.0, %v2618_v19  ;;  %v4358_v19 = vld [vmem:[#allocation11_spill] sm:$0xff] }
 0x33a   :  { %2621 = vrcp.f32 %v870_v31  ;;  %v4357_v31 = vld [vmem:[#allocation8_spill] sm:$0xff] }
 0x345   :  { %v2620_v57 = vpop.eup %2619 }
 0x346   :  { %v873_v17 = vmul.f32 %v2620_v57, %v856_v14  ;;  %v4356_v14 = vld [vmem:[#allocation7_spill] sm:$0xff] }
 0x347   :  { %v2622_v43 = vpop.eup %2621 }
 0x348   :  { %v874_v1 = vadd.f32 %v873_v17, %v4353_v56  ;;  %v876_v12 = vsub.f32 1.0, %v2622_v43  ;;  %v878_v61 = vmul.f32 %v2622_v43, %v3479_v15  ;;  %v4354_v17 = vld [vmem:[#allocation6_spill] sm:$0xff] }
 0x349   :  { %v4355_v15 = vld [vmem:[#allocation10_spill] sm:$0xff] }
 0x34a   :  { %2623 = vtanh.f32 %v874_v1  ;;  %v4361_v1 = vld [vmem:[#allocation17_spill] sm:$0xff] }
 0x357   :  { %v2624_v40 = vpop.eup %2623 }
 0x358   :  { %v877_v13 = vmul.f32 %v2624_v40, %v876_v12 }
 0x35a   :  { %v3557_v22 = vadd.f32 %v878_v61, %v877_v13  ;;  %v4362_v13 = vld [vmem:[#allocation19_spill] sm:$0xff] }
 0x35c   :  { %945 = vmatmul.mubr.f32.vlgmr.msra.gmra.mxu1 %v3557_v22  ;;  %2387 = vmatmul.mubr.f32.vlgmr.msra.gmra.mxu0 %v3557_v22 }
 0x35d   :  { %1043 = vmatpush1.msra.mxu1 %v3024_v23  ;;  %2390 = vmatpush3.msra.mxu0 %v3039_v27 }
 0x35e   :  { %1044 = vmatprep.subr.mxu1 %v3029_v25  ;;  %2391 = vmatprep.subr.mxu0 %v4341_v18 }
 0x35f   :  { %1045 = vmatpush1.msra.mxu1 %v3034_v26  ;;  %2392 = vmatpush3.msra.mxu0 %v3145_v50 }
 0x360   :  { %1046 = vmatprep.subr.mxu1 %v3045_v29  ;;  %2393 = vmatprep.subr.mxu0 %v4341_v18 }
 0x361   :  { %1047 = vmatpush1.msra.mxu1 %v3052_v30  ;;  %2394 = vmatpush3.msra.mxu0 %v3177_v55 }
 0x362   :  { %1048 = vmatprep.subr.mxu1 %v3058_v32  ;;  %2395 = vmatprep.subr.mxu0 %v4341_v18 }
 0x363   :  { %1049 = vmatpush1.msra.mxu1 %v3065_v33  ;;  %2396 = vmatpush3.msra.mxu0 %v3209_v62 }
 0x364   :  { %1050 = vmatprep.subr.mxu1 %v3071_v35  ;;  %2397 = vmatprep.subr.mxu0 %v4341_v18 }
 0x365   :  { %1051 = vmatpush1.msra.mxu1 %v3077_v36  ;;  %2398 = vmatpush3.msra.mxu0 %v3241_v3 }
 0x366   :  { %1052 = vmatprep.subr.mxu1 %v3084_v38  ;;  %2399 = vmatprep.subr.mxu0 %v4341_v18 }
 0x367   :  { %1053 = vmatpush1.msra.mxu1 %v3090_v39  ;;  %2400 = vmatpush3.msra.mxu0 %v3250_v4 }
 0x368   :  { %1054 = vmatprep.subr.mxu1 %v3096_v41  ;;  %2401 = vmatprep.subr.mxu0 %v4341_v18 }
 0x369   :  { %1055 = vmatpush1.msra.mxu1 %v3102_v42  ;;  %2402 = vmatpush3.msra.mxu0 %v3259_v5 }
 0x36a   :  { %1056 = vmatprep.subr.mxu1 %v3109_v44  ;;  %2403 = vmatprep.subr.mxu0 %v4341_v18 }
 0x36b   :  { %1057 = vmatpush1.msra.mxu1 %v3115_v45  ;;  %2404 = vmatpush3.msra.mxu0 %v3268_v6 }
 0x36c   :  { %1058 = vmatprep.subr.mxu1 %v3121_v46  ;;  %2405 = vmatprep.subr.mxu0 %v4341_v18 }
 0x36d   :  { %1059 = vmatpush1.msra.mxu1 %v3127_v47  ;;  %2406 = vmatpush3.msra.mxu0 %v3277_v7 }
 0x36e   :  { %1060 = vmatprep.subr.mxu1 %v3134_v48  ;;  %2407 = vmatprep.subr.mxu0 %v4341_v18 }
 0x36f   :  { %1061 = vmatpush1.msra.mxu1 %v3140_v49  ;;  %2408 = vmatpush3.msra.mxu0 %v3286_v8 }
 0x370   :  { %1062 = vmatprep.subr.mxu1 %v3152_v51  ;;  %2409 = vmatprep.subr.mxu0 %v4341_v18 }
 0x371   :  { %1063 = vmatpush1.msra.mxu1 %v3158_v52  ;;  %2410 = vmatpush3.msra.mxu0 %v3295_v9 }
 0x372   :  { %1064 = vmatprep.subr.mxu1 %v3165_v53  ;;  %2411 = vmatprep.subr.mxu0 %v4341_v18 }
 0x373   :  { %1065 = vmatpush1.msra.mxu1 %v3172_v54  ;;  %2412 = vmatpush3.msra.mxu0 %v3304_v10 }
 0x374   :  { %1066 = vmatprep.subr.mxu1 %v3184_v58  ;;  %2413 = vmatprep.subr.mxu0 %v4341_v18 }
 0x375   :  { %1067 = vmatpush1.msra.mxu1 %v3190_v59  ;;  %2414 = vmatpush3.msra.mxu0 %v3313_v11 }
 0x376   :  { %1068 = vmatprep.subr.mxu1 %v3197_v60  ;;  %2415 = vmatprep.subr.mxu0 %v4341_v18 }
 0x377   :  { %1069 = vmatpush1.msra.mxu1 %v4342_v37  ;;  %2416 = vmatpush3.msra.mxu0 %v4343_v24 }
 0x378   :  { %1070 = vmatprep.subr.mxu1 %v4344_v21  ;;  %2417 = vmatprep.subr.mxu0 %v4341_v18 }
 0x379   :  { %1071 = vmatpush1.msra.mxu1 %v4354_v17  ;;  %2418 = vmatpush3.msra.mxu0 %v4355_v15 }
 0x37a   :  { %1072 = vmatprep.subr.mxu1 %v4356_v14  ;;  %2419 = vmatprep.subr.mxu0 %v4341_v18 }
 0x37b   :  { %1073 = vmatpush1.msra.mxu1 %v4357_v31  ;;  %1106 = vmatprep.mubr.f32.mxu1 %v4341_v18 }
 0x37c   :  { %2420 = vmatpush3.msra.mxu0 %v4358_v19  ;;  %2421 = vmatprep.mubr.msk.f32.mxu0 %vm2740_vm8, %v4341_v18 }
 0x37d   :  { %1204 = vmatprep.subr.mxu1 %v4359_v20  ;;  %2424 = vmatprep.subr.mxu0 %v4341_v18 }
 0x41c   :  { %v946_v28 = vpop.f32.mrf.mxu1  ;;  %v1017_v16 = vpop.f32.mrf.mxu0 }
 0x41d   :  { %v947_v63 = vadd.f32 %v946_v28, %v4360_v0  ;;  %v1018_v17 = vadd.f32 %v1017_v16, %v3474_v34  ;;  %v3756_v16 = vld [vmem:[%s4272_s3 + $0x140] sm:$0xff] }
 0x41e   :  { %v948_v57 = vpop.f32.mrf.mxu1  ;;  %v2388_v56 = vpop.f32.mrf.mxu0 }
 0x41f   :  { %v1021_v43 = vadd.f32 %v947_v63, %v4361_v1  ;;  %v949_v40 = vadd.f32 %v948_v57, %v3469_v2  ;;  %v4363_v56 = vld [vmem:[#allocation16_spill] sm:$0xff] }
 0x421   :  { %v1982_v12 = vmul.f32 -1.442695, %v1021_v43  ;;  %v1028_v61 = vadd.f32 %v949_v40, %v4362_v13  ;;  %v3769_v13 = vld [vmem:[%s4272_s3 + $0x148] sm:$0xff] }
 0x423   :  { %2625 = vpow2.f32 %v1982_v12  ;;  %v1983_v19 = vmul.f32 -1.442695, %v1028_v61  ;;  %v3775_v61 = vld [vmem:[%s4272_s3 + $0x128] sm:$0xff] }
 0x425   :  { %2627 = vpow2.f32 %v1983_v19 }
 0x430   :  { %v2626_v31 = vpop.eup %2625 }
 0x431   :  { %v1025_v20 = vadd.f32 1.0, %v2626_v31  ;;  %v3750_v31 = vld [vmem:[%s4272_s3 + $0x160] sm:$0xff] }
 0x432   :  { %v2628_v14 = vpop.eup %2627 }
 0x433   :  { %2629 = vrcp.f32 %v1025_v20  ;;  %v1032_v15 = vadd.f32 1.0, %v2628_v14  ;;  %v3744_v14 = vld [vmem:[%s4272_s3 + $0x150] sm:$0xff]  ;;  %v3782_v20 = vld [vmem:[%s4272_s3 + $0x120] sm:$0xff] }
 0x435   :  { %2631 = vrcp.f32 %v1032_v15  ;;  %v3737_v15 = vld [vmem:[%s4272_s3 + $0x158] sm:$0xff] }
 0x440   :  { %v2630_v28 = vpop.eup %2629 }
 0x441   :  { %v1035_v0 = vmul.f32 %v2630_v28, %v1018_v17  ;;  %v3731_v17 = vld [vmem:[%s4272_s3 + $0x178] sm:$0xff]  ;;  %v3788_v28 = vld [vmem:[%s4272_s3 + $0x130] sm:$0xff] }
 0x442   :  { %v2632_v1 = vpop.eup %2631 }
 0x443   :  { %v1036_v63 = vadd.f32 %v1035_v0, %v4363_v56  ;;  %v1038_v57 = vsub.f32 1.0, %v2632_v1  ;;  %v1040_v40 = vmul.f32 %v2632_v1, %v3557_v22  ;;  %v3725_v22 = vld [vmem:[%s4272_s3 + $0x168] sm:$0xff]  ;;  %v3763_v0 = vld [vmem:[%s4272_s3 + $0x138] sm:$0xff]  ;;  %v3794_v56 = vld [vmem:[%s4272_s3 + $0x110] sm:$0xff] }
 0x444   :  { %v3807_v1 = vld [vmem:[%s4272_s3 + $0x118] sm:$0xff] }
 0x445   :  { %2633 = vtanh.f32 %v1036_v63  ;;  %v3801_v63 = vld [vmem:[%s4272_s3 + $0x108] sm:$0xff] }
 0x452   :  { %v2634_v43 = vpop.eup %2633 }
 0x453   :  { %v1039_v12 = vmul.f32 %v2634_v43, %v1038_v57  ;;  %v3813_v57 = vld [vmem:[%s4272_s3 + $0xf8] sm:$0xff]  ;;  %v3820_v43 = vld [vmem:[%s4272_s3 + $0xf0] sm:$0xff] }
 0x455   :  { %v3635_v19 = vadd.f32 %v1040_v40, %v1039_v12  ;;  %v3826_v12 = vld [vmem:[%s4272_s3 + $0x100] sm:$0xff] }
 0x456   :  { %v3832_v40 = vld [vmem:[%s4272_s3 + $0xe0] sm:$0xff] }
 0x457   :  { %1107 = vmatmul.mubr.f32.vlgmr.msra.gmra.mxu1 %v3635_v19  ;;  %2422 = vmatmul.mubr.f32.vlgmr.msra.gmra.mxu0 %v3635_v19 }
 0x458   :  { %1205 = vmatpush1.msra.mxu1 %v3024_v23  ;;  %2425 = vmatpush3.msra.mxu0 %v3039_v27  ;;  %v4364_v23 = vld [vmem:[#allocation6_spill] sm:$0xff]  ;;  %v4367_v27 = vld [vmem:[#allocation8_spill] sm:$0xff] }
 0x459   :  { %1206 = vmatprep.subr.mxu1 %v3029_v25  ;;  %2426 = vmatprep.subr.mxu0 %v4341_v18  ;;  %v4365_v25 = vld [vmem:[#allocation10_spill] sm:$0xff] }
 0x45a   :  { %1207 = vmatpush1.msra.mxu1 %v3034_v26  ;;  %2427 = vmatpush3.msra.mxu0 %v3145_v50  ;;  %v4366_v26 = vld [vmem:[#allocation7_spill] sm:$0xff] }
 0x45b   :  { %1208 = vmatprep.subr.mxu1 %v3045_v29  ;;  %2428 = vmatprep.subr.mxu0 %v4341_v18  ;;  %v4368_v29 = vld [vmem:[#allocation11_spill] sm:$0xff] }
 0x45c   :  { %1209 = vmatpush1.msra.mxu1 %v3052_v30  ;;  %2429 = vmatpush3.msra.mxu0 %v3177_v55  ;;  %v3707_v30 = vld [vmem:[%s4272_s3 + $0x170] sm:$0xff] }
 0x45d   :  { %1210 = vmatprep.subr.mxu1 %v3058_v32  ;;  %2430 = vmatprep.subr.mxu0 %v4341_v18 }
 0x45e   :  { %1211 = vmatpush1.msra.mxu1 %v3065_v33  ;;  %2431 = vmatpush3.msra.mxu0 %v3209_v62 }
 0x45f   :  { %1212 = vmatprep.subr.mxu1 %v3071_v35  ;;  %2432 = vmatprep.subr.mxu0 %v4341_v18  ;;  %v4369_v35 = vld [vmem:[#allocation32_spill] sm:$0xff] }
 0x460   :  { %1213 = vmatpush1.msra.mxu1 %v3077_v36  ;;  %2433 = vmatpush3.msra.mxu0 %v3241_v3 }
 0x461   :  { %1214 = vmatprep.subr.mxu1 %v3084_v38  ;;  %2434 = vmatprep.subr.mxu0 %v4341_v18 }
 0x462   :  { %1215 = vmatpush1.msra.mxu1 %v3090_v39  ;;  %2435 = vmatpush3.msra.mxu0 %v3250_v4 }
 0x463   :  { %1216 = vmatprep.subr.mxu1 %v3096_v41  ;;  %2436 = vmatprep.subr.mxu0 %v4341_v18  ;;  %v4370_v41 = vld [vmem:[#allocation21_spill] sm:$0xff] }
 0x464   :  { %1217 = vmatpush1.msra.mxu1 %v3102_v42  ;;  %2437 = vmatpush3.msra.mxu0 %v3259_v5 }
 0x465   :  { %1218 = vmatprep.subr.mxu1 %v3109_v44  ;;  %2438 = vmatprep.subr.mxu0 %v4341_v18 }
 0x466   :  { %1219 = vmatpush1.msra.mxu1 %v3115_v45  ;;  %2439 = vmatpush3.msra.mxu0 %v3268_v6 }
 0x467   :  { %1220 = vmatprep.subr.mxu1 %v3121_v46  ;;  %2440 = vmatprep.subr.mxu0 %v4341_v18  ;;  %v4371_v46 = vld [vmem:[#allocation23_spill] sm:$0xff] }
 0x468   :  { %1221 = vmatpush1.msra.mxu1 %v3127_v47  ;;  %2441 = vmatpush3.msra.mxu0 %v3277_v7 }
 0x469   :  { %1222 = vmatprep.subr.mxu1 %v3134_v48  ;;  %2442 = vmatprep.subr.mxu0 %v4341_v18 }
 0x46a   :  { %1223 = vmatpush1.msra.mxu1 %v3140_v49  ;;  %2443 = vmatpush3.msra.mxu0 %v3286_v8 }
 0x46b   :  { %1224 = vmatprep.subr.mxu1 %v3152_v51  ;;  %2444 = vmatprep.subr.mxu0 %v4341_v18 }
 0x46c   :  { %1225 = vmatpush1.msra.mxu1 %v3158_v52  ;;  %2445 = vmatpush3.msra.mxu0 %v3295_v9 }
 0x46d   :  { %1226 = vmatprep.subr.mxu1 %v3165_v53  ;;  %2446 = vmatprep.subr.mxu0 %v4341_v18 }
 0x46e   :  { %1227 = vmatpush1.msra.mxu1 %v3172_v54  ;;  %2447 = vmatpush3.msra.mxu0 %v3304_v10 }
 0x46f   :  { %1228 = vmatprep.subr.mxu1 %v3184_v58  ;;  %2448 = vmatprep.subr.mxu0 %v4341_v18  ;;  %v4372_v58 = vld [vmem:[#allocation14_spill] sm:$0xff] }
 0x470   :  { %1229 = vmatpush1.msra.mxu1 %v3190_v59  ;;  %2449 = vmatpush3.msra.mxu0 %v3313_v11 }
 0x471   :  { %1230 = vmatprep.subr.mxu1 %v3197_v60  ;;  %2450 = vmatprep.subr.mxu0 %v4341_v18 }
 0x472   :  { %1231 = vmatpush1.msra.mxu1 %v4342_v37  ;;  %2451 = vmatpush3.msra.mxu0 %v4343_v24 }
 0x473   :  { %1232 = vmatprep.subr.mxu1 %v4344_v21  ;;  %2452 = vmatprep.subr.mxu0 %v4341_v18 }
 0x474   :  { %1233 = vmatpush1.msra.mxu1 %v4364_v23  ;;  %2453 = vmatpush3.msra.mxu0 %v4365_v25  ;;  %v3846_v23 = vld [vmem:[%s4272_s3 + $0xc8] sm:$0xff] }
 0x475   :  { %1234 = vmatprep.subr.mxu1 %v4366_v26  ;;  %2454 = vmatprep.subr.mxu0 %v4341_v18  ;;  %v3853_v26 = vld [vmem:[%s4272_s3 + $0xc0] sm:$0xff] }
 0x476   :  { %1235 = vmatpush1.msra.mxu1 %v4367_v27  ;;  %1268 = vmatprep.mubr.f32.mxu1 %v4341_v18  ;;  %v3867_v27 = vld [vmem:[%s4272_s3 + $0xa8] sm:$0xff] }
 0x477   :  { %2455 = vmatpush3.msra.mxu0 %v4368_v29  ;;  %2456 = vmatprep.mubr.msk.f32.mxu0 %vm2740_vm8, %v4341_v18 }
 0x478   :  { %1366 = vmatprep.subr.mxu1 %v3707_v30  ;;  %2459 = vmatprep.subr.mxu0 %v4341_v18 }
 0x517   :  { %v1108_v32 = vpop.f32.mrf.mxu1  ;;  %v1179_v33 = vpop.f32.mrf.mxu0 }
 0x518   :  { %v1109_v36 = vadd.f32 %v1108_v32, %v4369_v35  ;;  %v1180_v53 = vadd.f32 %v1179_v33, %v3474_v34  ;;  %v3881_v32 = vld [vmem:[%s4272_s3 + $0x90] sm:$0xff]  ;;  %v3895_v33 = vld [vmem:[%s4272_s3 + $0x78] sm:$0xff] }
 0x519   :  { %v1110_v38 = vpop.f32.mrf.mxu1  ;;  %v2423_v39 = vpop.f32.mrf.mxu0 }
 0x51a   :  { %v1183_v42 = vadd.f32 %v1109_v36, %v4370_v41  ;;  %v1111_v45 = vadd.f32 %v1110_v38, %v3469_v2  ;;  %v3909_v36 = vld [vmem:[%s4272_s3 + $0x60] sm:$0xff]  ;;  %v3923_v38 = vld [vmem:[%s4272_s3 + $0x48] sm:$0xff]  ;;  %v3937_v39 = vld [vmem:[%s4272_s3 + $0x30] sm:$0xff] }
 0x51b   :  { %v3951_v41 = vld [vmem:[%s4272_s3 + $0x18] sm:$0xff] }
 0x51c   :  { %v1984_v44 = vmul.f32 -1.442695, %v1183_v42  ;;  %v1190_v47 = vadd.f32 %v1111_v45, %v4371_v46  ;;  %4373 = vst [vmem:[#allocation4_spill] sm:$0xff] %v3951_v41  ;;  %v3965_v42 = vld [vmem:[%s4272_s3] sm:$0xff] }
 0x51d   :  { %4375 = vst [vmem:[#allocation5_spill] sm:$0xff] %v3965_v42 }
 0x51e   :  { %2635 = vpow2.f32 %v1984_v44  ;;  %v1985_v48 = vmul.f32 -1.442695, %v1190_v47 }
 0x520   :  { %2637 = vpow2.f32 %v1985_v48  ;;  %v4376_v48 = vld [vmem:[#allocation25_spill] sm:$0xff] }
 0x52b   :  { %v2636_v49 = vpop.eup %2635 }
 0x52c   :  { %v1187_v50 = vadd.f32 1.0, %v2636_v49 }
 0x52d   :  { %v2638_v51 = vpop.eup %2637 }
 0x52e   :  { %2639 = vrcp.f32 %v1187_v50  ;;  %v1194_v52 = vadd.f32 1.0, %v2638_v51 }
 0x530   :  { %2641 = vrcp.f32 %v1194_v52 }
 0x53b   :  { %v2640_v54 = vpop.eup %2639 }
 0x53c   :  { %v1197_v55 = vmul.f32 %v2640_v54, %v1180_v53 }
 0x53d   :  { %v2642_v60 = vpop.eup %2641 }
 0x53e   :  { %v1198_v59 = vadd.f32 %v1197_v55, %v4372_v58  ;;  %v1200_v62 = vsub.f32 1.0, %v2642_v60  ;;  %v1202_v37 = vmul.f32 %v2642_v60, %v3635_v19  ;;  %v3839_v19 = vld [vmem:[%s4272_s3 + $0xd8] sm:$0xff] }
 0x540   :  { %2643 = vtanh.f32 %v1198_v59 }
 0x54d   :  { %v2644_v3 = vpop.eup %2643 }
 0x54e   :  { %v1201_v4 = vmul.f32 %v2644_v3, %v1200_v62 }
 0x550   :  { %v3718_v21 = vadd.f32 %v1202_v37, %v1201_v4  ;;  %v4378_v4 = vld [vmem:[#allocation20_spill] sm:$0xff] }
 0x552   :  { %1269 = vmatmul.mubr.f32.vlgmr.msra.gmra.mxu1 %v3718_v21  ;;  %2457 = vmatmul.mubr.f32.vlgmr.msra.gmra.mxu0 %v3718_v21 }
 0x553   :  { %1367 = vmatpush1.msra.mxu1 %v3725_v22  ;;  %2460 = vmatpush3.msra.mxu0 %v3731_v17 }
 0x554   :  { %1368 = vmatprep.subr.mxu1 %v3737_v15  ;;  %2461 = vmatprep.subr.mxu0 %v4341_v18 }
 0x555   :  { %1369 = vmatpush1.msra.mxu1 %v3744_v14  ;;  %2462 = vmatpush3.msra.mxu0 %v3750_v31 }
 0x556   :  { %1370 = vmatprep.subr.mxu1 %v3756_v16  ;;  %2463 = vmatprep.subr.mxu0 %v4341_v18 }
 0x557   :  { %1371 = vmatpush1.msra.mxu1 %v3763_v0  ;;  %2464 = vmatpush3.msra.mxu0 %v3769_v13 }
 0x558   :  { %1372 = vmatprep.subr.mxu1 %v3775_v61  ;;  %2465 = vmatprep.subr.mxu0 %v4341_v18 }
 0x559   :  { %1373 = vmatpush1.msra.mxu1 %v3782_v20  ;;  %2466 = vmatpush3.msra.mxu0 %v3788_v28 }
 0x55a   :  { %1374 = vmatprep.subr.mxu1 %v3794_v56  ;;  %2467 = vmatprep.subr.mxu0 %v4341_v18 }
 0x55b   :  { %1375 = vmatpush1.msra.mxu1 %v3801_v63  ;;  %2468 = vmatpush3.msra.mxu0 %v3807_v1 }
 0x55c   :  { %1376 = vmatprep.subr.mxu1 %v3813_v57  ;;  %2469 = vmatprep.subr.mxu0 %v4341_v18 }
 0x55d   :  { %1377 = vmatpush1.msra.mxu1 %v3820_v43  ;;  %2470 = vmatpush3.msra.mxu0 %v3826_v12 }
 0x55e   :  { %1378 = vmatprep.subr.mxu1 %v3832_v40  ;;  %2471 = vmatprep.subr.mxu0 %v4341_v18 }
 0x55f   :  { %1379 = vmatpush1.msra.mxu1 %v3839_v19  ;;  %2472 = vmatpush3.msra.mxu0 %v3259_v5  ;;  %v3860_v5 = vld [vmem:[%s4272_s3 + $0xb0] sm:$0xff] }
 0x560   :  { %1380 = vmatprep.subr.mxu1 %v3846_v23  ;;  %2473 = vmatprep.subr.mxu0 %v4341_v18 }
 0x561   :  { %1381 = vmatpush1.msra.mxu1 %v3853_v26  ;;  %2474 = vmatpush3.msra.mxu0 %v3268_v6  ;;  %v3874_v6 = vld [vmem:[%s4272_s3 + $0x98] sm:$0xff] }
 0x562   :  { %1382 = vmatprep.subr.mxu1 %v3860_v5  ;;  %2475 = vmatprep.subr.mxu0 %v4341_v18 }
 0x563   :  { %1383 = vmatpush1.msra.mxu1 %v3867_v27  ;;  %2476 = vmatpush3.msra.mxu0 %v3277_v7  ;;  %v3888_v7 = vld [vmem:[%s4272_s3 + $0x80] sm:$0xff] }
 0x564   :  { %1384 = vmatprep.subr.mxu1 %v3874_v6  ;;  %2477 = vmatprep.subr.mxu0 %v4341_v18 }
 0x565   :  { %1385 = vmatpush1.msra.mxu1 %v3881_v32  ;;  %2478 = vmatpush3.msra.mxu0 %v3286_v8  ;;  %v3902_v8 = vld [vmem:[%s4272_s3 + $0x68] sm:$0xff] }
 0x566   :  { %1386 = vmatprep.subr.mxu1 %v3888_v7  ;;  %2479 = vmatprep.subr.mxu0 %v4341_v18 }
 0x567   :  { %1387 = vmatpush1.msra.mxu1 %v3895_v33  ;;  %2480 = vmatpush3.msra.mxu0 %v3295_v9  ;;  %v3916_v9 = vld [vmem:[%s4272_s3 + $0x50] sm:$0xff] }
 0x568   :  { %1388 = vmatprep.subr.mxu1 %v3902_v8  ;;  %2481 = vmatprep.subr.mxu0 %v4341_v18 }
 0x569   :  { %1389 = vmatpush1.msra.mxu1 %v3909_v36  ;;  %2482 = vmatpush3.msra.mxu0 %v3304_v10  ;;  %v3930_v10 = vld [vmem:[%s4272_s3 + $0x38] sm:$0xff] }
 0x56a   :  { %1390 = vmatprep.subr.mxu1 %v3916_v9  ;;  %2483 = vmatprep.subr.mxu0 %v4341_v18 }
 0x56b   :  { %1391 = vmatpush1.msra.mxu1 %v3923_v38  ;;  %2484 = vmatpush3.msra.mxu0 %v3313_v11  ;;  %v3944_v11 = vld [vmem:[%s4272_s3 + $0x20] sm:$0xff] }
 0x56c   :  { %1392 = vmatprep.subr.mxu1 %v3930_v10  ;;  %2485 = vmatprep.subr.mxu0 %v4341_v18 }
 0x56d   :  { %1393 = vmatpush1.msra.mxu1 %v3937_v39  ;;  %2486 = vmatpush3.msra.mxu0 %v4343_v24  ;;  %v3958_v24 = vld [vmem:[%s4272_s3 + $0x8] sm:$0xff] }
 0x56e   :  { %1394 = vmatprep.subr.mxu1 %v3944_v11  ;;  %2487 = vmatprep.subr.mxu0 %v4341_v18  ;;  %4374 = vst [vmem:[#allocation9_spill] sm:$0xff] %v3958_v24 }
 0x56f   :  { %1395 = vmatpush1.msra.mxu1 %v3951_v41  ;;  %2488 = vmatpush3.msra.mxu0 %v4365_v25 }
 0x570   :  { %1396 = vmatprep.subr.mxu1 %v3958_v24  ;;  %2489 = vmatprep.subr.mxu0 %v4341_v18 }
 0x571   :  { %1397 = vmatpush1.msra.mxu1 %v3965_v42  ;;  %1430 = vmatprep.mubr.f32.mxu1 %v4341_v18 }
 0x572   :  { %2490 = vmatpush3.msra.mxu0 %v4368_v29  ;;  %2491 = vmatprep.mubr.msk.f32.mxu0 %vm2740_vm8, %v4341_v18  ;;  %v4377_v29 = vld [vmem:[#allocation26_spill] sm:$0xff] }
 0x573   :  { %1528 = vmatprep.subr.mxu1 %v3707_v30  ;;  %2494 = vmatprep.subr.mxu0 %v4341_v18 }
 0x612   :  { %v1270_v25 = vpop.f32.mrf.mxu1  ;;  %v1341_v44 = vpop.f32.mrf.mxu0 }
 0x613   :  { %v1271_v45 = vadd.f32 %v1270_v25, %v4369_v35  ;;  %v1342_v60 = vadd.f32 %v1341_v44, %v3474_v34  ;;  %v4022_v44 = vld [vmem:[%s4272_s3 + $0xd0] sm:$0xff] }
 0x614   :  { %v1272_v46 = vpop.f32.mrf.mxu1  ;;  %v2458_v47 = vpop.f32.mrf.mxu0 }
 0x615   :  { %v1345_v49 = vadd.f32 %v1271_v45, %v4376_v48  ;;  %v1273_v51 = vadd.f32 %v1272_v46, %v3469_v2 }
 0x617   :  { %v1986_v50 = vmul.f32 -1.442695, %v1345_v49  ;;  %v1352_v52 = vadd.f32 %v1273_v51, %v4377_v29  ;;  %v4040_v51 = vld [vmem:[%s4272_s3 + $0xa0] sm:$0xff]  ;;  %v4049_v29 = vld [vmem:[%s4272_s3 + $0x88] sm:$0xff] }
 0x619   :  { %2645 = vpow2.f32 %v1986_v50  ;;  %v1987_v53 = vmul.f32 -1.442695, %v1352_v52  ;;  %v4031_v50 = vld [vmem:[%s4272_s3 + $0xb8] sm:$0xff]  ;;  %v4058_v52 = vld [vmem:[%s4272_s3 + $0x70] sm:$0xff] }
 0x61b   :  { %2647 = vpow2.f32 %v1987_v53  ;;  %v4067_v53 = vld [vmem:[%s4272_s3 + $0x58] sm:$0xff] }
 0x626   :  { %v2646_v54 = vpop.eup %2645 }
 0x627   :  { %v1349_v55 = vadd.f32 1.0, %v2646_v54  ;;  %v4076_v54 = vld [vmem:[%s4272_s3 + $0x40] sm:$0xff] }
 0x628   :  { %v2648_v58 = vpop.eup %2647 }
 0x629   :  { %2649 = vrcp.f32 %v1349_v55  ;;  %v1356_v59 = vadd.f32 1.0, %v2648_v58  ;;  %v4085_v55 = vld [vmem:[%s4272_s3 + $0x28] sm:$0xff]  ;;  %v4095_v58 = vld [vmem:[%s4272_s3 + $0x10] sm:$0xff] }
 0x62a   :  { %4379 = vst [vmem:[#allocation13_spill] sm:$0xff] %v4085_v55  ;;  %4380 = vst [vmem:[#allocation15_spill] sm:$0xff] %v4095_v58 }
 0x62b   :  { %2651 = vrcp.f32 %v1356_v59 }
 0x636   :  { %v2650_v62 = vpop.eup %2649 }
 0x637   :  { %v1359_v3 = vmul.f32 %v2650_v62, %v1342_v60 }
 0x638   :  { %v2652_v25 = vpop.eup %2651 }
 0x639   :  { %v1360_v37 = vadd.f32 %v1359_v3, %v4378_v4  ;;  %v1362_v45 = vsub.f32 1.0, %v2652_v25  ;;  %v1364_v48 = vmul.f32 %v2652_v25, %v3718_v21  ;;  %v4013_v21 = vld [vmem:[%s4272_s3 + $0xe8] sm:$0xff] }
 0x63b   :  { %2653 = vtanh.f32 %v1360_v37  ;;  %v4381_v37 = vld [vmem:[#allocation27_spill] sm:$0xff] }
 0x648   :  { %v2654_v46 = vpop.eup %2653 }
 0x649   :  { %v1363_v47 = vmul.f32 %v2654_v46, %v1362_v45 }
 0x64b   :  { %v3981_v49 = vadd.f32 %v1364_v48, %v1363_v47  ;;  %v4382_v47 = vld [vmem:[#allocation28_spill] sm:$0xff] }
 0x64d   :  { %1431 = vmatmul.mubr.f32.vlgmr.msra.gmra.mxu1 %v3981_v49  ;;  %2492 = vmatmul.mubr.f32.vlgmr.msra.gmra.mxu0 %v3981_v49 }
 0x64e   :  { %1529 = vmatpush1.msra.mxu1 %v3725_v22  ;;  %2495 = vmatpush3.msra.mxu0 %v3731_v17 }
 0x64f   :  { %1530 = vmatprep.subr.mxu1 %v3737_v15  ;;  %2496 = vmatprep.subr.mxu0 %v4341_v18 }
 0x650   :  { %1531 = vmatpush1.msra.mxu1 %v3744_v14  ;;  %2497 = vmatpush3.msra.mxu0 %v3750_v31 }
 0x651   :  { %1532 = vmatprep.subr.mxu1 %v3756_v16  ;;  %2498 = vmatprep.subr.mxu0 %v4341_v18 }
 0x652   :  { %1533 = vmatpush1.msra.mxu1 %v3763_v0  ;;  %2499 = vmatpush3.msra.mxu0 %v3769_v13 }
 0x653   :  { %1534 = vmatprep.subr.mxu1 %v3775_v61  ;;  %2500 = vmatprep.subr.mxu0 %v4341_v18 }
 0x654   :  { %1535 = vmatpush1.msra.mxu1 %v3782_v20  ;;  %2501 = vmatpush3.msra.mxu0 %v3788_v28 }
 0x655   :  { %1536 = vmatprep.subr.mxu1 %v3794_v56  ;;  %2502 = vmatprep.subr.mxu0 %v4341_v18 }
 0x656   :  { %1537 = vmatpush1.msra.mxu1 %v3801_v63  ;;  %2503 = vmatpush3.msra.mxu0 %v3807_v1 }
 0x657   :  { %1538 = vmatprep.subr.mxu1 %v3813_v57  ;;  %2504 = vmatprep.subr.mxu0 %v4341_v18 }
 0x658   :  { %1539 = vmatpush1.msra.mxu1 %v3820_v43  ;;  %2505 = vmatpush3.msra.mxu0 %v3826_v12 }
 0x659   :  { %1540 = vmatprep.subr.mxu1 %v3832_v40  ;;  %2506 = vmatprep.subr.mxu0 %v4341_v18 }
 0x65a   :  { %1541 = vmatpush1.msra.mxu1 %v3839_v19  ;;  %2507 = vmatpush3.msra.mxu0 %v4013_v21 }
 0x65b   :  { %1542 = vmatprep.subr.mxu1 %v3846_v23  ;;  %2508 = vmatprep.subr.mxu0 %v4341_v18 }
 0x65c   :  { %1543 = vmatpush1.msra.mxu1 %v3853_v26  ;;  %2509 = vmatpush3.msra.mxu0 %v4022_v44 }
 0x65d   :  { %1544 = vmatprep.subr.mxu1 %v3860_v5  ;;  %2510 = vmatprep.subr.mxu0 %v4341_v18 }
 0x65e   :  { %1545 = vmatpush1.msra.mxu1 %v3867_v27  ;;  %2511 = vmatpush3.msra.mxu0 %v4031_v50 }
 0x65f   :  { %1546 = vmatprep.subr.mxu1 %v3874_v6  ;;  %2512 = vmatprep.subr.mxu0 %v4341_v18 }
 0x660   :  { %1547 = vmatpush1.msra.mxu1 %v3881_v32  ;;  %2513 = vmatpush3.msra.mxu0 %v4040_v51 }
 0x661   :  { %1548 = vmatprep.subr.mxu1 %v3888_v7  ;;  %2514 = vmatprep.subr.mxu0 %v4341_v18 }
 0x662   :  { %1549 = vmatpush1.msra.mxu1 %v3895_v33  ;;  %2515 = vmatpush3.msra.mxu0 %v4049_v29 }
 0x663   :  { %1550 = vmatprep.subr.mxu1 %v3902_v8  ;;  %2516 = vmatprep.subr.mxu0 %v4341_v18 }
 0x664   :  { %1551 = vmatpush1.msra.mxu1 %v3909_v36  ;;  %2517 = vmatpush3.msra.mxu0 %v4058_v52 }
 0x665   :  { %1552 = vmatprep.subr.mxu1 %v3916_v9  ;;  %2518 = vmatprep.subr.mxu0 %v4341_v18 }
 0x666   :  { %1553 = vmatpush1.msra.mxu1 %v3923_v38  ;;  %2519 = vmatpush3.msra.mxu0 %v4067_v53 }
 0x667   :  { %1554 = vmatprep.subr.mxu1 %v3930_v10  ;;  %2520 = vmatprep.subr.mxu0 %v4341_v18 }
 0x668   :  { %1555 = vmatpush1.msra.mxu1 %v3937_v39  ;;  %2521 = vmatpush3.msra.mxu0 %v4076_v54 }
 0x669   :  { %1556 = vmatprep.subr.mxu1 %v3944_v11  ;;  %2522 = vmatprep.subr.mxu0 %v4341_v18 }
 0x66a   :  { %1557 = vmatpush1.msra.mxu1 %v3951_v41  ;;  %2523 = vmatpush3.msra.mxu0 %v4085_v55 }
 0x66b   :  { %1558 = vmatprep.subr.mxu1 %v3958_v24  ;;  %2524 = vmatprep.subr.mxu0 %v4341_v18 }
 0x66c   :  { %1559 = vmatpush1.msra.mxu1 %v3965_v42  ;;  %1592 = vmatprep.mubr.f32.mxu1 %v4341_v18 }
 0x66d   :  { %2525 = vmatpush3.msra.mxu0 %v4095_v58  ;;  %2526 = vmatprep.mubr.msk.f32.mxu0 %vm2740_vm8, %v4341_v18 }
 0x66e   :  { %1690 = vmatprep.subr.mxu1 %v3707_v30  ;;  %2529 = vmatprep.subr.mxu0 %v4341_v18 }
 0x70d   :  { %v1432_v59 = vpop.f32.mrf.mxu1  ;;  %v1503_v60 = vpop.f32.mrf.mxu0 }
 0x70e   :  { %v1433_v62 = vadd.f32 %v1432_v59, %v4369_v35  ;;  %v1504_v41 = vadd.f32 %v1503_v60, %v3474_v34  ;;  %v1852_v60 = vld [vmem:[%s4275_s6] sm:$0xff] }
 0x70f   :  { %v1434_v3 = vpop.f32.mrf.mxu1  ;;  %v2493_v4 = vpop.f32.mrf.mxu0 }
 0x710   :  { %v1507_v25 = vadd.f32 %v1433_v62, %v4381_v37  ;;  %v1435_v46 = vadd.f32 %v1434_v3, %v3469_v2  ;;  %v4383_v4 = vld [vmem:[#allocation18_spill] sm:$0xff] }
 0x712   :  { %v1988_v45 = vmul.f32 -1.442695, %v1507_v25  ;;  %v1514_v48 = vadd.f32 %v1435_v46, %v4382_v47 }
 0x714   :  { %2655 = vpow2.f32 %v1988_v45  ;;  %v1989_v58 = vmul.f32 -1.442695, %v1514_v48 }
 0x716   :  { %2657 = vpow2.f32 %v1989_v58 }
 0x721   :  { %v2656_v42 = vpop.eup %2655 }
 0x722   :  { %v1511_v30 = vadd.f32 1.0, %v2656_v42  ;;  %v1863_v42 = vld [vmem:[%s4275_s6 + $0x58] sm:$0xff] }
 0x723   :  { %v2658_v24 = vpop.eup %2657 }
 0x724   :  { %2659 = vrcp.f32 %v1511_v30  ;;  %v1518_v55 = vadd.f32 1.0, %v2658_v24  ;;  %v1864_v24 = vld [vmem:[%s4275_s6 + $0x60] sm:$0xff] }
 0x726   :  { %2661 = vrcp.f32 %v1518_v55  ;;  %v1853_v55 = vld [vmem:[%s4275_s6 + $0x8] sm:$0xff] }
 0x731   :  { %v2660_v59 = vpop.eup %2659 }
 0x732   :  { %v1521_v35 = vmul.f32 %v2660_v59, %v1504_v41  ;;  %v1865_v41 = vld [vmem:[%s4275_s6 + $0x68] sm:$0xff] }
 0x733   :  { %v2662_v37 = vpop.eup %2661 }
 0x734   :  { %v1522_v62 = vadd.f32 %v1521_v35, %v4383_v4  ;;  %v1524_v3 = vsub.f32 1.0, %v2662_v37  ;;  %v1526_v46 = vmul.f32 %v2662_v37, %v3981_v49  ;;  %v4384_v35 = vld [vmem:[#allocation4_spill] sm:$0xff] }
 0x735   :  { %v1862_v49 = vld [vmem:[%s4275_s6 + $0x50] sm:$0xff] }
 0x736   :  { %2663 = vtanh.f32 %v1522_v62  ;;  %v4393_v62 = vld [vmem:[#allocation31_spill] sm:$0xff] }
 0x743   :  { %v2664_v25 = vpop.eup %2663 }
 0x744   :  { %v1525_v45 = vmul.f32 %v2664_v25, %v1524_v3 }
 0x746   :  { %v4109_v58 = vadd.f32 %v1526_v46, %v1525_v45  ;;  %v4394_v45 = vld [vmem:[#allocation33_spill] sm:$0xff] }
 0x748   :  { %1593 = vmatmul.mubr.f32.vlgmr.msra.gmra.mxu1 %v4109_v58  ;;  %2527 = vmatmul.mubr.f32.vlgmr.msra.gmra.mxu0 %v4109_v58 }
 0x749   :  { %1691 = vmatpush1.msra.mxu1 %v3725_v22  ;;  %2530 = vmatpush3.msra.mxu0 %v3731_v17  ;;  %v4385_v22 = vld [vmem:[#allocation13_spill] sm:$0xff] }
 0x74a   :  { %1692 = vmatprep.subr.mxu1 %v3737_v15  ;;  %2531 = vmatprep.subr.mxu0 %v4341_v18  ;;  %v4386_v17 = vld [vmem:[#allocation9_spill] sm:$0xff] }
 0x74b   :  { %1693 = vmatpush1.msra.mxu1 %v3744_v14  ;;  %2532 = vmatpush3.msra.mxu0 %v3750_v31  ;;  %v4387_v15 = vld [vmem:[#allocation5_spill] sm:$0xff]  ;;  %v4388_v14 = vld [vmem:[#allocation15_spill] sm:$0xff] }
 0x74c   :  { %1694 = vmatprep.subr.mxu1 %v3756_v16  ;;  %2533 = vmatprep.subr.mxu0 %v4341_v18 }
 0x74d   :  { %1695 = vmatpush1.msra.mxu1 %v3763_v0  ;;  %2534 = vmatpush3.msra.mxu0 %v3769_v13  ;;  %v4389_v0 = vld [vmem:[#allocation32_spill] sm:$0xff] }
 0x74e   :  { %1696 = vmatprep.subr.mxu1 %v3775_v61  ;;  %2535 = vmatprep.subr.mxu0 %v4341_v18 }
 0x74f   :  { %1697 = vmatpush1.msra.mxu1 %v3782_v20  ;;  %2536 = vmatpush3.msra.mxu0 %v3788_v28  ;;  %v4390_v28 = vld [vmem:[#allocation29_spill] sm:$0xff] }
 0x750   :  { %1698 = vmatprep.subr.mxu1 %v3794_v56  ;;  %2537 = vmatprep.subr.mxu0 %v4341_v18 }
 0x751   :  { %1699 = vmatpush1.msra.mxu1 %v3801_v63  ;;  %2538 = vmatpush3.msra.mxu0 %v3807_v1 }
 0x752   :  { %1700 = vmatprep.subr.mxu1 %v3813_v57  ;;  %2539 = vmatprep.subr.mxu0 %v4341_v18  ;;  %v4391_v57 = vld [vmem:[#allocation30_spill] sm:$0xff] }
 0x753   :  { %1701 = vmatpush1.msra.mxu1 %v3820_v43  ;;  %2540 = vmatpush3.msra.mxu0 %v3826_v12 }
 0x754   :  { %1702 = vmatprep.subr.mxu1 %v3832_v40  ;;  %2541 = vmatprep.subr.mxu0 %v4341_v18 }
 0x755   :  { %1703 = vmatpush1.msra.mxu1 %v3839_v19  ;;  %2542 = vmatpush3.msra.mxu0 %v4013_v21  ;;  %v1861_v21 = vld [vmem:[%s4275_s6 + $0x48] sm:$0xff] }
 0x756   :  { %1704 = vmatprep.subr.mxu1 %v3846_v23  ;;  %2543 = vmatprep.subr.mxu0 %v4341_v18 }
 0x757   :  { %1705 = vmatpush1.msra.mxu1 %v3853_v26  ;;  %2544 = vmatpush3.msra.mxu0 %v4022_v44  ;;  %v1860_v44 = vld [vmem:[%s4275_s6 + $0x40] sm:$0xff] }
 0x758   :  { %1706 = vmatprep.subr.mxu1 %v3860_v5  ;;  %2545 = vmatprep.subr.mxu0 %v4341_v18 }
 0x759   :  { %1707 = vmatpush1.msra.mxu1 %v3867_v27  ;;  %2546 = vmatpush3.msra.mxu0 %v4031_v50  ;;  %v1859_v50 = vld [vmem:[%s4275_s6 + $0x38] sm:$0xff] }
 0x75a   :  { %1708 = vmatprep.subr.mxu1 %v3874_v6  ;;  %2547 = vmatprep.subr.mxu0 %v4341_v18 }
 0x75b   :  { %1709 = vmatpush1.msra.mxu1 %v3881_v32  ;;  %2548 = vmatpush3.msra.mxu0 %v4040_v51  ;;  %v4392_v32 = vld [vmem:[#allocation24_spill] sm:$0xff] }
 0x75c   :  { %1710 = vmatprep.subr.mxu1 %v3888_v7  ;;  %2549 = vmatprep.subr.mxu0 %v4341_v18  ;;  %v1858_v51 = vld [vmem:[%s4275_s6 + $0x30] sm:$0xff] }
 0x75d   :  { %1711 = vmatpush1.msra.mxu1 %v3895_v33  ;;  %2550 = vmatpush3.msra.mxu0 %v4049_v29  ;;  %v1857_v29 = vld [vmem:[%s4275_s6 + $0x28] sm:$0xff] }
 0x75e   :  { %1712 = vmatprep.subr.mxu1 %v3902_v8  ;;  %2551 = vmatprep.subr.mxu0 %v4341_v18 }
 0x75f   :  { %1713 = vmatpush1.msra.mxu1 %v3909_v36  ;;  %2552 = vmatpush3.msra.mxu0 %v4058_v52  ;;  %v1856_v52 = vld [vmem:[%s4275_s6 + $0x20] sm:$0xff] }
 0x760   :  { %1714 = vmatprep.subr.mxu1 %v3916_v9  ;;  %2553 = vmatprep.subr.mxu0 %v4341_v18 }
 0x761   :  { %1715 = vmatpush1.msra.mxu1 %v3923_v38  ;;  %2554 = vmatpush3.msra.mxu0 %v4067_v53  ;;  %v1855_v53 = vld [vmem:[%s4275_s6 + $0x18] sm:$0xff] }
 0x762   :  { %1716 = vmatprep.subr.mxu1 %v3930_v10  ;;  %2555 = vmatprep.subr.mxu0 %v4341_v18 }
 0x763   :  { %1717 = vmatpush1.msra.mxu1 %v3937_v39  ;;  %2556 = vmatpush3.msra.mxu0 %v4076_v54  ;;  %v1867_v39 = vld [vmem:[%s4275_s6 + $0x78] sm:$0xff]  ;;  %v1854_v54 = vld [vmem:[%s4275_s6 + $0x10] sm:$0xff] }
 0x764   :  { %1718 = vmatprep.subr.mxu1 %v3944_v11  ;;  %2557 = vmatprep.subr.mxu0 %v4341_v18  ;;  %v1866_v11 = vld [vmem:[%s4275_s6 + $0x70] sm:$0xff] }
 0x765   :  { %1719 = vmatpush1.msra.mxu1 %v4384_v35  ;;  %2558 = vmatpush3.msra.mxu0 %v4385_v22 }
 0x766   :  { %1720 = vmatprep.subr.mxu1 %v4386_v17  ;;  %2559 = vmatprep.subr.mxu0 %v4341_v18 }
 0x767   :  { %1721 = vmatpush1.msra.mxu1 %v4387_v15  ;;  %1754 = vmatprep.mubr.f32.mxu1 %v4341_v18 }
 0x768   :  { %2560 = vmatpush3.msra.mxu0 %v4388_v14  ;;  %2561 = vmatprep.mubr.msk.f32.mxu0 %vm2740_vm8, %v4341_v18 }
 0x769   :  { %2564 = vmatprep.subr.mxu1 %v4341_v18 }
 0x808   :  { %v1594_v31 = vpop.f32.mrf.mxu1  ;;  %v1665_v16 = vpop.f32.mrf.mxu0 }
 0x809   :  { %v1595_v13 = vadd.f32 %v1594_v31, %v4389_v0  ;;  %v1666_v5 = vadd.f32 %v1665_v16, %v3474_v34  ;;  %v4395_v16 = vld [vmem:[#allocation22_spill] sm:$0xff] }
 0x80a   :  { %v1596_v61 = vpop.f32.mrf.mxu1  ;;  %v2528_v20 = vpop.f32.mrf.mxu0 }
 0x80b   :  { %v1669_v56 = vadd.f32 %v1595_v13, %v4390_v28  ;;  %v1597_v1 = vadd.f32 %v1596_v61, %v3469_v2 }
 0x80d   :  { %v1990_v63 = vmul.f32 -1.442695, %v1669_v56  ;;  %v1676_v43 = vadd.f32 %v1597_v1, %v4391_v57 }
 0x80f   :  { %2665 = vpow2.f32 %v1990_v63  ;;  %v1991_v12 = vmul.f32 -1.442695, %v1676_v43  ;;  %v1994_v63 = vld [vmem:[%s4276_s7] ss:$0 sm:$0xff] }
 0x811   :  { %2667 = vpow2.f32 %v1991_v12 }
 0x81c   :  { %v2666_v40 = vpop.eup %2665 }
 0x81d   :  { %v1673_v19 = vadd.f32 1.0, %v2666_v40 }
 0x81e   :  { %v2668_v23 = vpop.eup %2667 }
 0x81f   :  { %2669 = vrcp.f32 %v1673_v19  ;;  %v1680_v26 = vadd.f32 1.0, %v2668_v23 }
 0x821   :  { %2671 = vrcp.f32 %v1680_v26 }
 0x82c   :  { %v2670_v27 = vpop.eup %2669 }
 0x82d   :  { %v1683_v6 = vmul.f32 %v2670_v27, %v1666_v5 }
 0x82e   :  { %v2672_v33 = vpop.eup %2671 }
 0x82f   :  { %v1684_v7 = vadd.f32 %v1683_v6, %v4392_v32  ;;  %v1686_v8 = vsub.f32 1.0, %v2672_v33  ;;  %v1688_v38 = vmul.f32 %v2672_v33, %v4109_v58 }
 0x831   :  { %2673 = vtanh.f32 %v1684_v7 }
 0x83e   :  { %v2674_v36 = vpop.eup %2673 }
 0x83f   :  { %v1687_v9 = vmul.f32 %v2674_v36, %v1686_v8 }
 0x841   :  { %v4186_v10 = vadd.f32 %v1688_v38, %v1687_v9 }
 0x843   :  { %1755 = vmatmul.mubr.f32.vlgmr.msra.gmra.mxu1 %v4186_v10  ;;  %2562 = vmatmul.mubr.f32.vlgmr.msra.gmra.mxu0 %v4186_v10 }
 0x844   :  { %2596 = vmatprep.mubr.msk.f32.mxu1 %vm2740_vm8, %v4341_v18  ;;  %2565 = vmatpush3.msra.mxu1 %v1867_v39 }
 0x845   :  { %2566 = vmatprep.subr.mxu1 %v4341_v18 }
 0x846   :  { %2567 = vmatpush3.msra.mxu1 %v1866_v11 }
 0x847   :  { %2568 = vmatprep.subr.mxu1 %v4341_v18 }
 0x848   :  { %2569 = vmatpush3.msra.mxu1 %v1865_v41 }
 0x849   :  { %2570 = vmatprep.subr.mxu1 %v4341_v18 }
 0x84a   :  { %2571 = vmatpush3.msra.mxu1 %v1864_v24 }
 0x84b   :  { %2572 = vmatprep.subr.mxu1 %v4341_v18 }
 0x84c   :  { %2573 = vmatpush3.msra.mxu1 %v1863_v42 }
 0x84d   :  { %2574 = vmatprep.subr.mxu1 %v4341_v18 }
 0x84e   :  { %2575 = vmatpush3.msra.mxu1 %v1862_v49 }
 0x84f   :  { %2576 = vmatprep.subr.mxu1 %v4341_v18 }
 0x850   :  { %2577 = vmatpush3.msra.mxu1 %v1861_v21 }
 0x851   :  { %2578 = vmatprep.subr.mxu1 %v4341_v18 }
 0x852   :  { %2579 = vmatpush3.msra.mxu1 %v1860_v44 }
 0x853   :  { %2580 = vmatprep.subr.mxu1 %v4341_v18 }
 0x854   :  { %2581 = vmatpush3.msra.mxu1 %v1859_v50 }
 0x855   :  { %2582 = vmatprep.subr.mxu1 %v4341_v18 }
 0x856   :  { %2583 = vmatpush3.msra.mxu1 %v1858_v51 }
 0x857   :  { %2584 = vmatprep.subr.mxu1 %v4341_v18 }
 0x858   :  { %2585 = vmatpush3.msra.mxu1 %v1857_v29 }
 0x859   :  { %2586 = vmatprep.subr.mxu1 %v4341_v18 }
 0x85a   :  { %2587 = vmatpush3.msra.mxu1 %v1856_v52 }
 0x85b   :  { %2588 = vmatprep.subr.mxu1 %v4341_v18 }
 0x85c   :  { %2589 = vmatpush3.msra.mxu1 %v1855_v53 }
 0x85d   :  { %2590 = vmatprep.subr.mxu1 %v4341_v18 }
 0x85e   :  { %2591 = vmatpush3.msra.mxu1 %v1854_v54 }
 0x85f   :  { %2592 = vmatprep.subr.mxu1 %v4341_v18 }
 0x860   :  { %2593 = vmatpush3.msra.mxu1 %v1853_v55 }
 0x861   :  { %2594 = vmatprep.subr.mxu1 %v4341_v18 }
 0x862   :  { %2595 = vmatpush3.msra.mxu1 %v1852_v60 }
 0x903   :  { %v1756_v47 = vpop.f32.mrf.mxu1  ;;  %v1827_v48 = vpop.f32.mrf.mxu0 }
 0x904   :  { %v1757_v30 = vadd.f32 %v1756_v47, %v4389_v0  ;;  %v1828_v15 = vadd.f32 %v1827_v48, %v3474_v34  ;;  %v4396_v34 = vld [vmem:[#allocation2_spill] sm:$0xff] }
 0x905   :  { %v1758_v59 = vpop.f32.mrf.mxu1  ;;  %v2563_v4 = vpop.f32.mrf.mxu0  ;;  %vm1945_vm9 = vcmp.lt.s32.totalorder %v4396_v34, 4 }
 0x906   :  { %v1831_v37 = vadd.f32 %v1757_v30, %v4393_v62  ;;  %v1759_v25 = vadd.f32 %v1758_v59, %v3469_v2 }
 0x908   :  { %v1992_v3 = vmul.f32 -1.442695, %v1831_v37  ;;  %v1838_v46 = vadd.f32 %v1759_v25, %v4394_v45 }
 0x90a   :  { %2675 = vpow2.f32 %v1992_v3  ;;  %v1993_v58 = vmul.f32 -1.442695, %v1838_v46 }
 0x90c   :  { %2677 = vpow2.f32 %v1993_v58 }
 0x917   :  { %v2676_v35 = vpop.eup %2675 }
 0x918   :  { %v1835_v22 = vadd.f32 1.0, %v2676_v35 }
 0x919   :  { %v2678_v18 = vpop.eup %2677 }
 0x91a   :  { %2679 = vrcp.f32 %v1835_v22  ;;  %v1842_v17 = vadd.f32 1.0, %v2678_v18 }
 0x91c   :  { %2681 = vrcp.f32 %v1842_v17 }
 0x927   :  { %v2680_v14 = vpop.eup %2679 }
 0x928   :  { %v1845_v31 = vmul.f32 %v2680_v14, %v1828_v15 }
 0x929   :  { %v2682_v13 = vpop.eup %2681 }
 0x92a   :  { %v1846_v0 = vadd.f32 %v1845_v31, %v4395_v16  ;;  %v1848_v2 = vsub.f32 1.0, %v2682_v13  ;;  %v1850_v28 = vmul.f32 %v2682_v13, %v4186_v10 }
 0x92c   :  { %2683 = vtanh.f32 %v1846_v0 }
 0x939   :  { %v2684_v61 = vpop.eup %2683 }
 0x93a   :  { %v1849_v20 = vmul.f32 %v2684_v61, %v1848_v2 }
 0x93c   :  { %v1851_v56 = vadd.f32 %v1850_v28, %v1849_v20 }
 0x93e   :  { %2597 = vmatmul.mubr.f32.vlgmr.msra.gmra.mxu1 %v1851_v56 }
 0x9fe   :  { %v1941_v1 = vpop.f32.mrf.mxu1 }
 0x9ff   :  { %v1942_v57 = vadd.f32 %v1994_v63, %v1941_v1 }
 0xa00   :  { %v2598_v43 = vpop.f32.mrf.mxu1 }
 0xa01   :  { %v1946_v12 = vsel %vm1945_vm9, %v1942_v57, -1e+30 }
 0xa02   :  { %1947 = vmax.xlane.f32.xlu0 %v1946_v12 }
 0xa8b   :  { %v1948_v40 = vpop.xlane.xlu0 %1947 }
 0xa8c   :  { %v1949_v19 = vsub.f32 %v1946_v12, %v1948_v40 }
 0xa8e   :  { %v1950_v23 = vmul.f32 1.442695, %v1949_v19 }
 0xa90   :  { %2685 = vpow2.f32 %v1950_v23 }
 0xa9d   :  { %v2686_v26 = vpop.eup %2685 }
 0xa9e   :  { %1952 = vadd.xlane.f32.xlu1 %v2686_v26 }
 0xb27   :  { %v1953_v5 = vpop.xlane.xlu1 %1952 }
 0xb28   :  { %2687 = vlog2.f32 %v1953_v5 }
 0xb35   :  { %v2688_v27 = vpop.eup %2687 }
 0xb36   :  { %v1955_v6 = vmul.f32 0.6931472, %v2688_v27 }
 0xb38   :  { %v1956_v32 = vsub.f32 %v1949_v19, %v1955_v6 }
 0xb3a   :  { %1957 = vst [vmem:[%s4277_s8] sm:$0xff] %v1956_v32 }

</bundles_post_ra>
